<compile_context>
chip_gen: v7x
topology: tpu7x:2x2x1
jax: 0.10.0
libtpu: 0.0.40
codegen_flags: <defaults>
</compile_context>

<pallas_src>
import jax
import jax.numpy as jnp
from jax import lax
from jax.experimental import pallas as pl
from jax.experimental.pallas import tpu as pltpu


_DEF_VMEM_BUDGET = 8 * 1024 * 1024  # per-step block footprint target (bytes)


# --------------------------------------------------------------------------- #
# Fused kernel: conv-transpose + 2x2 interleave, writes NCHW directly.
# --------------------------------------------------------------------------- #
def _fused_kernel(x_ref, wk_ref, b_ref, d_ref, o_ref):
    """One (batch, row-tile) step.

    x_ref : (1, C_in, h_tile, W)    NCHW input rows
    wk_ref: (2, 2, C_out, C_in)     wk[di, dj, co, ci] = W[ci, co, di, dj]
    b_ref : (C_out, 1)              bias
    d_ref : (W, 2W)                 0/1 duplication matrix, D[w, c] = (c // 2 == w)
    o_ref : (1, C_out, h_tile, 4W)  output rows, free view of NCHW (.., 2H, 2W)
    """
    c_in, h_t, w_in = x_ref.shape[1], x_ref.shape[2], x_ref.shape[3]
    c_out = o_ref.shape[1]
    w2 = 2 * w_in

    d = d_ref[...].astype(jnp.float32)            # (W, 2W)
    wk = wk_ref[...].astype(jnp.float32)          # (2, 2, C_out, C_in)
    # dj parity of the interleaved output columns (lane index % 2).
    dj_is_odd = (lax.broadcasted_iota(jnp.int32, (1, w2), 1) % 2) == 1

    accs = [jnp.zeros((c_out, h_t, w2), jnp.float32) for _ in range(2)]
    for ci in range(c_in):                        # small C_in: unrolled VPU FMAs
        x_ci = x_ref[0, ci].astype(jnp.float32)   # (h_tile, W)
        # Exact lane duplication: xd[h, 2w + dj] = x[h, w].
        xd = jnp.dot(x_ci, d, preferred_element_type=jnp.float32,
                     precision=lax.Precision.HIGHEST)         # (h_tile, 2W)
        xd = xd[None, :, :]                                   # (1, h_tile, 2W)
        for di in range(2):
            w_even = wk[di, 0, :, ci:ci + 1]                  # (C_out, 1)
            w_odd = wk[di, 1, :, ci:ci + 1]                   # (C_out, 1)
            w_lane = jnp.where(dj_is_odd, w_odd, w_even)      # (C_out, 2W)
            accs[di] = accs[di] + w_lane[:, None, :] * xd     # (C_out, h_t, 2W)

    bias_lane = b_ref[...].astype(jnp.float32) * jnp.ones((1, w2), jnp.float32)
    for di in range(2):
        row_pair = (accs[di] + bias_lane[:, None, :]).astype(o_ref.dtype)
        # Row parity di lands in lane half [di*2W, (di+1)*2W) of the 4W row pair.
        o_ref[0, :, :, di * w2:(di + 1) * w2] = row_pair


# --------------------------------------------------------------------------- #
# Fallback kernel for large C_in: flat-lane MXU matmul (interleave done by XLA).
# --------------------------------------------------------------------------- #
def _flat_matmul_kernel(x_ref, w_ref, b_ref, o_ref):
    # x_ref: (1, C_in, TM)  w_ref: (4*C_out, C_in)  b_ref: (4*C_out, 1)
    # o_ref: (1, 4*C_out, TM)
    acc = jnp.dot(w_ref[...].astype(jnp.float32), x_ref[0].astype(jnp.float32),
                  preferred_element_type=jnp.float32,
                  precision=lax.Precision.HIGHEST)
    o_ref[0] = (acc + b_ref[...].astype(jnp.float32)).astype(o_ref.dtype)


# --------------------------------------------------------------------------- #
# Tile selection (VMEM-budget driven).
# --------------------------------------------------------------------------- #
def _pick_h_tile(n, h, w, c_in, c_out, dtype_bytes, budget=_DEF_VMEM_BUDGET):
    """Row tile: multiple of 8 dividing H (or H itself), largest under the VMEM
    budget, preferring >= 4 total grid steps (v7x: 2 TensorCores + pipelining)."""
    cands = sorted({ht for ht in range(8, h + 1, 8) if h % ht == 0} | {h},
                   reverse=True)

    def foot(ht):
        in_blk = c_in * ht * w * dtype_bytes
        out_blk = c_out * ht * 4 * w * dtype_bytes
        acc_f32 = 2 * c_out * ht * 2 * w * 4
        return 2 * (in_blk + out_blk) + acc_f32        # double-buffered blocks

    fitting = [ht for ht in cands if foot(ht) <= budget]
    if not fitting:
        return cands[-1]                               # correctness first
    for min_steps in (4, 2):
        for ht in fitting:                             # descending: biggest first
            if n * (h // ht) >= min_steps:
                return ht
    return fitting[0]


def _pick_tm(hw_padded, c_in, c_out, dtype_bytes, budget=_DEF_VMEM_BUDGET):
    """Flat spatial tile for the fallback path (multiple of 128, divides plane)."""
    per_lane = 2 * (c_in + 4 * c_out) * dtype_bytes + 4 * c_out * 4
    cap = max(128, (budget // max(per_lane, 1)) // 128 * 128)
    t = min(cap, hw_padded)
    while t > 128 and hw_padded % t != 0:
        t -= 128
    return t


# --------------------------------------------------------------------------- #
# Wrappers.
# --------------------------------------------------------------------------- #
def _upsample_fused(x, weight, bias, out_dtype, dtype_bytes, budget):
    n, c_in, h, w = x.shape
    c_out = weight.shape[1]
    h_tile = _pick_h_tile(n, h, w, c_in, c_out, dtype_bytes, budget)

    # wk[di, dj, co, ci] = weight[ci, co, di, dj]; tiny & grid-invariant.
    wk = jnp.transpose(weight, (2, 3, 1, 0)).astype(jnp.float32)
    b2 = bias.reshape(c_out, 1).astype(jnp.float32)
    # Exact 0/1 lane-duplication matrix: D[w, c] = 1 iff c // 2 == w.
    dup = (jnp.arange(w)[:, None] == (jnp.arange(2 * w)[None, :] // 2))
    dup = dup.astype(jnp.float32)

    in_bytes = n * c_in * h * w * dtype_bytes
    out_bytes = n * 4 * c_out * h * w * jnp.dtype(out_dtype).itemsize
    cost = pl.CostEstimate(
        flops=2 * n * h * w * c_in * (4 * c_out + 2 * w),
        transcendentals=0,
        bytes_accessed=in_bytes + out_bytes + 4 * (wk.size + b2.size + dup.size),
    )

    out_view = pl.pallas_call(
        _fused_kernel,
        out_shape=jax.ShapeDtypeStruct((n, c_out, h, 4 * w), out_dtype),
        grid_spec=pltpu.PrefetchScalarGridSpec(
            num_scalar_prefetch=0,
            grid=(n, h // h_tile),
            in_specs=[
                pl.BlockSpec((1, c_in, h_tile, w), lambda ni, ri: (ni, 0, ri, 0)),
                pl.BlockSpec((2, 2, c_out, c_in), lambda ni, ri: (0, 0, 0, 0)),
                pl.BlockSpec((c_out, 1), lambda ni, ri: (0, 0)),
                pl.BlockSpec((w, 2 * w), lambda ni, ri: (0, 0)),
            ],
            out_specs=pl.BlockSpec((1, c_out, h_tile, 4 * w),
                                   lambda ni, ri: (ni, 0, ri, 0)),
        ),
        compiler_params=pltpu.CompilerParams(
            dimension_semantics=("parallel", "parallel"),
            vmem_limit_bytes=32 * 1024 * 1024,
        ),
        cost_estimate=cost,
    )(x, wk, b2, dup)

    # (N, C_out, H, 4W) is a free (contiguous) view of NCHW (N, C_out, 2H, 2W):
    # lane index = di*2W + 2w + dj  ==  the contiguous row pair (2h, 2h+1).
    return out_view.reshape(n, c_out, 2 * h, 2 * w)


def _upsample_flat(x, weight, bias, out_dtype, dtype_bytes, budget):
    """Large-C_in fallback: MXU channel matmul on flat lanes; one XLA pass then
    scatters the 4 kernel positions into NCHW (costs an extra output read+write,
    but keeps the in-kernel contraction a single big 2-D MXU matmul)."""
    n, c_in, h, w = x.shape
    c_out = weight.shape[1]
    hw = h * w
    hw_p = ((hw + 127) // 128) * 128                 # pad lanes to 128 (old TODO)
    x_flat = x.reshape(n, c_in, hw)
    if hw_p != hw:
        x_flat = jnp.pad(x_flat, ((0, 0), (0, 0), (0, hw_p - hw)))
    tm = _pick_tm(hw_p, c_in, c_out, dtype_bytes, budget)

    # Rows ordered (co, di, dj) to match the post-kernel scatter below.
    w_flat = jnp.transpose(weight, (1, 2, 3, 0)).reshape(4 * c_out, c_in)
    w_flat = w_flat.astype(x.dtype)
    b_flat = jnp.repeat(bias, 4).reshape(4 * c_out, 1).astype(jnp.float32)

    w_bytes = w_flat.size * w_flat.dtype.itemsize
    if w_bytes >= (1 << 20):
        # Grid-invariant operand: one buffer is enough, reclaim double-buffer VMEM.
        w_spec = pl.BlockSpec((4 * c_out, c_in), lambda ni, mi: (0, 0),
                              pipeline_mode=pl.Buffered(1))
    else:
        w_spec = pl.BlockSpec((4 * c_out, c_in), lambda ni, mi: (0, 0))

    cost = pl.CostEstimate(
        flops=2 * n * hw_p * 4 * c_out * c_in,
        transcendentals=0,
        bytes_accessed=n * hw_p * (c_in + 4 * c_out) * dtype_bytes + 4 * w_flat.size,
    )

    out_flat = pl.pallas_call(
        _flat_matmul_kernel,
        out_shape=jax.ShapeDtypeStruct((n, 4 * c_out, hw_p), out_dtype),
        grid_spec=pltpu.PrefetchScalarGridSpec(
            num_scalar_prefetch=0,
            grid=(n, hw_p // tm),
            in_specs=[
                pl.BlockSpec((1, c_in, tm), lambda ni, mi: (ni, 0, mi)),
                w_spec,
                pl.BlockSpec((4 * c_out, 1), lambda ni, mi: (0, 0)),
            ],
            out_specs=pl.BlockSpec((1, 4 * c_out, tm), lambda ni, mi: (ni, 0, mi)),
        ),
        compiler_params=pltpu.CompilerParams(
            dimension_semantics=("parallel", "parallel"),
            vmem_limit_bytes=32 * 1024 * 1024,
        ),
        cost_estimate=cost,
    )(x_flat, w_flat, b_flat)

    out_flat = out_flat[:, :, :hw]
    out = out_flat.reshape(n, c_out, 2, 2, h, w)
    out = jnp.transpose(out, (0, 1, 4, 2, 5, 3)).reshape(n, c_out, 2 * h, 2 * w)
    return out


def upsample_forward(x, weight, bias, *, max_fused_cin=16, use_bf16=False,
                     out_dtype=None, vmem_budget=_DEF_VMEM_BUDGET):
    """ConvTranspose2d(kernel_size=2, stride=2) + Dropout2d(p=0) forward pass.

    x      : (N, C_in, H, W)       NCHW, as in the PyTorch module
    weight : (C_in, C_out, 2, 2)   PyTorch ConvTranspose2d layout
    bias   : (C_out,)
    returns: (N, C_out, 2H, 2W)
    """
    n, c_in, h, w = x.shape
    c_in_w, c_out, kh, kw = weight.shape
    assert (kh, kw) == (2, 2) and c_in_w == c_in
    out_dtype = x.dtype if out_dtype is None else out_dtype
    in_dtype = jnp.bfloat16 if use_bf16 else x.dtype   # optional ~2x on HBM bytes
    xk = x.astype(in_dtype)
    dtype_bytes = jnp.dtype(in_dtype).itemsize

    if c_in <= max_fused_cin:
        return _upsample_fused(xk, weight, bias, out_dtype, dtype_bytes, vmem_budget)
    return _upsample_flat(xk, weight, bias, out_dtype, dtype_bytes, vmem_budget)


def reference_upsample(x, weight, bias):
    """Pure-JAX reference of ConvTranspose2d(k=2, s=2)."""
    n, _, h, w = x.shape
    c_out = weight.shape[1]
    y = jnp.einsum('ncij,copq->noipjq', x, weight,
                   precision=lax.Precision.HIGHEST)
    return y.reshape(n, c_out, 2 * h, 2 * w) + bias[None, :, None, None]


if __name__ == "__main__":
    key = jax.random.PRNGKey(0)
    k_x, k_w, k_b, k_x2, k_w2, k_b2 = jax.random.split(key, 6)

    fwd = jax.jit(upsample_forward)

    # --- main demo shape (fused in-kernel interleave path) ---
    n, c_in, c_out, h, w = 2, 4, 8, 16, 16
    bound = 1.0 / jnp.sqrt(jnp.float32(c_in * 2 * 2))
    x = jax.random.normal(k_x, (n, c_in, h, w), dtype=jnp.float32)
    weight = jax.random.uniform(k_w, (c_in, c_out, 2, 2),
                                minval=-bound, maxval=bound, dtype=jnp.float32)
    bias = jax.random.uniform(k_b, (c_out,),
                              minval=-bound, maxval=bound, dtype=jnp.float32)

    out = jax.block_until_ready(fwd(x, weight, bias))
    ref = reference_upsample(x, weight, bias)
    assert out.shape == (n, c_out, 2 * h, 2 * w)
    assert jnp.allclose(out, ref, atol=1e-4, rtol=1e-4), \
        float(jnp.max(jnp.abs(out - ref)))

    # --- large-C_in fallback path (flat MXU matmul + padded spatial axis) ---
    nb, cib, cob, hb, wb = 1, 40, 8, 8, 8
    bound_b = 1.0 / jnp.sqrt(jnp.float32(cib * 2 * 2))
    xb = jax.random.normal(k_x2, (nb, cib, hb, wb), dtype=jnp.float32)
    weight_b = jax.random.uniform(k_w2, (cib, cob, 2, 2),
                                  minval=-bound_b, maxval=bound_b,
                                  dtype=jnp.float32)
    bias_b = jax.random.uniform(k_b2, (cob,),
                                minval=-bound_b, maxval=bound_b,
                                dtype=jnp.float32)
    out_b = jax.block_until_ready(fwd(xb, weight_b, bias_b))
    ref_b = reference_upsample(xb, weight_b, bias_b)
    assert jnp.allclose(out_b, ref_b, atol=1e-4, rtol=1e-4), \
        float(jnp.max(jnp.abs(out_b - ref_b)))

    print("KERNEL_OK")
</pallas_src>

<mosaic_0001>
module attributes {stable_mosaic.version = 11 : i64} {
  func.func @_fused_kernel(%arg0: i32, %arg1: i32, %arg2: memref<1x4x8x16xf32, #tpu.memory_space<vmem>>, %arg3: memref<2x2x8x4xf32, #tpu.memory_space<vmem>>, %arg4: memref<8x1xf32, #tpu.memory_space<vmem>>, %arg5: memref<16x32xf32, #tpu.memory_space<vmem>>, %arg6: memref<1x8x8x64xf32, #tpu.memory_space<vmem>>) attributes {dimension_semantics = [#tpu.dimension_semantics<parallel>, #tpu.dimension_semantics<parallel>], iteration_bounds = array<i64: 2, 2>, scalar_prefetch = 0 : i64, scratch_operands = 0 : i64, tpu.core_type = #tpu.core_type<tc>, window_params = [{transform_indices = @transform_0, window_bounds = array<i64: 1, 4, 8, 16>}, {pipeline_mode = #tpu.pipeline_mode<synchronous>, transform_indices = @transform_1, window_bounds = array<i64: 2, 2, 8, 4>}, {pipeline_mode = #tpu.pipeline_mode<synchronous>, transform_indices = @transform_2, window_bounds = array<i64: 8, 1>}, {pipeline_mode = #tpu.pipeline_mode<synchronous>, transform_indices = @transform_3, window_bounds = array<i64: 16, 32>}, {transform_indices = @transform_4, window_bounds = array<i64: 1, 8, 8, 64>}]} {
    %c0 = arith.constant 0 : index
    %c0_0 = arith.constant 0 : index
    %0 = vector.load %arg5[%c0, %c0_0] : memref<16x32xf32, #tpu.memory_space<vmem>>, vector<16x32xf32>
    %c0_1 = arith.constant 0 : index
    %c0_2 = arith.constant 0 : index
    %c0_3 = arith.constant 0 : index
    %c0_4 = arith.constant 0 : index
    %1 = vector.load %arg3[%c0_1, %c0_2, %c0_3, %c0_4] : memref<2x2x8x4xf32, #tpu.memory_space<vmem>>, vector<2x2x8x4xf32>
    %2 = tpu.iota {dimensions = array<i32: 1>} : vector<1x32xi32>
    %c2_i32 = arith.constant 2 : i32
    %c0_i32 = arith.constant 0 : i32
    %3 = arith.cmpi eq, %c2_i32, %c0_i32 : i32
    %c1_i32 = arith.constant 1 : i32
    %4 = arith.select %3, %c1_i32, %c2_i32 : i32
    %5 = vector.broadcast %4 : i32 to vector<1x32xi32>
    %6 = arith.remsi %2, %5 : vector<1x32xi32>
    %c0_i32_5 = arith.constant 0 : i32
    %7 = vector.broadcast %c0_i32_5 : i32 to vector<1x32xi32>
    %8 = arith.cmpi ne, %6, %7 : vector<1x32xi32>
    %c0_i32_6 = arith.constant 0 : i32
    %9 = vector.broadcast %c0_i32_6 : i32 to vector<1x32xi32>
    %10 = arith.cmpi slt, %6, %9 : vector<1x32xi32>
    %c0_i32_7 = arith.constant 0 : i32
    %11 = arith.cmpi slt, %4, %c0_i32_7 : i32
    %12 = vector.broadcast %11 : i1 to vector<1x32xi1>
    %13 = vector.broadcast %12 : vector<1x32xi1> to vector<1x32xi1>
    %14 = arith.xori %10, %13 : vector<1x32xi1>
    %15 = arith.andi %14, %8 : vector<1x32xi1>
    %16 = vector.broadcast %4 : i32 to vector<1x32xi32>
    %17 = arith.addi %6, %16 : vector<1x32xi32>
    %18 = arith.select %15, %17, %6 : vector<1x32xi1>, vector<1x32xi32>
    %c1_i32_8 = arith.constant 1 : i32
    %19 = vector.broadcast %c1_i32_8 : i32 to vector<1x32xi32>
    %20 = arith.cmpi eq, %18, %19 : vector<1x32xi32>
    %cst = arith.constant 0.000000e+00 : f32
    %21 = vector.broadcast %cst : f32 to vector<8x8x32xf32>
    %cst_9 = arith.constant 0.000000e+00 : f32
    %22 = vector.broadcast %cst_9 : f32 to vector<8x8x32xf32>
    %c0_10 = arith.constant 0 : index
    %c0_11 = arith.constant 0 : index
    %c0_12 = arith.constant 0 : index
    %c0_13 = arith.constant 0 : index
    %23 = vector.load %arg2[%c0_10, %c0_11, %c0_12, %c0_13] : memref<1x4x8x16xf32, #tpu.memory_space<vmem>>, vector<1x1x8x16xf32>
    %24 = vector.shape_cast %23 : vector<1x1x8x16xf32> to vector<8x16xf32>
    %cst_14 = arith.constant dense<0.000000e+00> : vector<8x32xf32>
    %25 = tpu.matmul %24, %0, %cst_14 {dimension_numbers = #tpu.dot_dimension_numbers<[1], [0], [0], [1], [0, 0, 1, 1], [], []>, precision = #tpu.contract_precision<fp32>} : vector<8x16xf32>, vector<16x32xf32>, vector<8x32xf32> -> vector<8x32xf32>
    %26 = vector.shape_cast %25 : vector<8x32xf32> to vector<1x8x32xf32>
    %27 = vector.extract_strided_slice %1 {offsets = [0, 0, 0, 0], sizes = [1, 1, 8, 1], strides = [1, 1, 1, 1]} : vector<2x2x8x4xf32> to vector<1x1x8x1xf32>
    %28 = vector.shape_cast %27 : vector<1x1x8x1xf32> to vector<8x1xf32>
    %29 = vector.extract_strided_slice %1 {offsets = [0, 1, 0, 0], sizes = [1, 1, 8, 1], strides = [1, 1, 1, 1]} : vector<2x2x8x4xf32> to vector<1x1x8x1xf32>
    %30 = vector.shape_cast %29 : vector<1x1x8x1xf32> to vector<8x1xf32>
    %31 = vector.shape_cast %20 : vector<1x32xi1> to vector<1x32xi1>
    %32 = vector.broadcast %31 : vector<1x32xi1> to vector<8x32xi1>
    %33 = vector.shape_cast %30 : vector<8x1xf32> to vector<8x1xf32>
    %34 = vector.broadcast %33 : vector<8x1xf32> to vector<8x32xf32>
    %35 = vector.shape_cast %28 : vector<8x1xf32> to vector<8x1xf32>
    %36 = vector.broadcast %35 : vector<8x1xf32> to vector<8x32xf32>
    %37 = arith.select %32, %34, %36 : vector<8x32xi1>, vector<8x32xf32>
    %38 = vector.shape_cast %37 : vector<8x32xf32> to vector<8x1x32xf32>
    %39 = vector.broadcast %38 : vector<8x1x32xf32> to vector<8x8x32xf32>
    %40 = vector.broadcast %26 : vector<1x8x32xf32> to vector<8x8x32xf32>
    %41 = arith.mulf %39, %40 : vector<8x8x32xf32>
    %42 = arith.addf %21, %41 : vector<8x8x32xf32>
    %43 = vector.extract_strided_slice %1 {offsets = [1, 0, 0, 0], sizes = [1, 1, 8, 1], strides = [1, 1, 1, 1]} : vector<2x2x8x4xf32> to vector<1x1x8x1xf32>
    %44 = vector.shape_cast %43 : vector<1x1x8x1xf32> to vector<8x1xf32>
    %45 = vector.extract_strided_slice %1 {offsets = [1, 1, 0, 0], sizes = [1, 1, 8, 1], strides = [1, 1, 1, 1]} : vector<2x2x8x4xf32> to vector<1x1x8x1xf32>
    %46 = vector.shape_cast %45 : vector<1x1x8x1xf32> to vector<8x1xf32>
    %47 = vector.shape_cast %20 : vector<1x32xi1> to vector<1x32xi1>
    %48 = vector.broadcast %47 : vector<1x32xi1> to vector<8x32xi1>
    %49 = vector.shape_cast %46 : vector<8x1xf32> to vector<8x1xf32>
    %50 = vector.broadcast %49 : vector<8x1xf32> to vector<8x32xf32>
    %51 = vector.shape_cast %44 : vector<8x1xf32> to vector<8x1xf32>
    %52 = vector.broadcast %51 : vector<8x1xf32> to vector<8x32xf32>
    %53 = arith.select %48, %50, %52 : vector<8x32xi1>, vector<8x32xf32>
    %54 = vector.shape_cast %53 : vector<8x32xf32> to vector<8x1x32xf32>
    %55 = vector.broadcast %54 : vector<8x1x32xf32> to vector<8x8x32xf32>
    %56 = vector.broadcast %26 : vector<1x8x32xf32> to vector<8x8x32xf32>
    %57 = arith.mulf %55, %56 : vector<8x8x32xf32>
    %58 = arith.addf %22, %57 : vector<8x8x32xf32>
    %c0_15 = arith.constant 0 : index
    %c1 = arith.constant 1 : index
    %c0_16 = arith.constant 0 : index
    %c0_17 = arith.constant 0 : index
    %59 = vector.load %arg2[%c0_15, %c1, %c0_16, %c0_17] : memref<1x4x8x16xf32, #tpu.memory_space<vmem>>, vector<1x1x8x16xf32>
    %60 = vector.shape_cast %59 : vector<1x1x8x16xf32> to vector<8x16xf32>
    %cst_18 = arith.constant dense<0.000000e+00> : vector<8x32xf32>
    %61 = tpu.matmul %60, %0, %cst_18 {dimension_numbers = #tpu.dot_dimension_numbers<[1], [0], [0], [1], [0, 0, 1, 1], [], []>, precision = #tpu.contract_precision<fp32>} : vector<8x16xf32>, vector<16x32xf32>, vector<8x32xf32> -> vector<8x32xf32>
    %62 = vector.shape_cast %61 : vector<8x32xf32> to vector<1x8x32xf32>
    %63 = vector.extract_strided_slice %1 {offsets = [0, 0, 0, 1], sizes = [1, 1, 8, 1], strides = [1, 1, 1, 1]} : vector<2x2x8x4xf32> to vector<1x1x8x1xf32>
    %64 = vector.shape_cast %63 : vector<1x1x8x1xf32> to vector<8x1xf32>
    %65 = vector.extract_strided_slice %1 {offsets = [0, 1, 0, 1], sizes = [1, 1, 8, 1], strides = [1, 1, 1, 1]} : vector<2x2x8x4xf32> to vector<1x1x8x1xf32>
    %66 = vector.shape_cast %65 : vector<1x1x8x1xf32> to vector<8x1xf32>
    %67 = vector.shape_cast %20 : vector<1x32xi1> to vector<1x32xi1>
    %68 = vector.broadcast %67 : vector<1x32xi1> to vector<8x32xi1>
    %69 = vector.shape_cast %66 : vector<8x1xf32> to vector<8x1xf32>
    %70 = vector.broadcast %69 : vector<8x1xf32> to vector<8x32xf32>
    %71 = vector.shape_cast %64 : vector<8x1xf32> to vector<8x1xf32>
    %72 = vector.broadcast %71 : vector<8x1xf32> to vector<8x32xf32>
    %73 = arith.select %68, %70, %72 : vector<8x32xi1>, vector<8x32xf32>
    %74 = vector.shape_cast %73 : vector<8x32xf32> to vector<8x1x32xf32>
    %75 = vector.broadcast %74 : vector<8x1x32xf32> to vector<8x8x32xf32>
    %76 = vector.broadcast %62 : vector<1x8x32xf32> to vector<8x8x32xf32>
    %77 = arith.mulf %75, %76 : vector<8x8x32xf32>
    %78 = arith.addf %42, %77 : vector<8x8x32xf32>
    %79 = vector.extract_strided_slice %1 {offsets = [1, 0, 0, 1], sizes = [1, 1, 8, 1], strides = [1, 1, 1, 1]} : vector<2x2x8x4xf32> to vector<1x1x8x1xf32>
    %80 = vector.shape_cast %79 : vector<1x1x8x1xf32> to vector<8x1xf32>
    %81 = vector.extract_strided_slice %1 {offsets = [1, 1, 0, 1], sizes = [1, 1, 8, 1], strides = [1, 1, 1, 1]} : vector<2x2x8x4xf32> to vector<1x1x8x1xf32>
    %82 = vector.shape_cast %81 : vector<1x1x8x1xf32> to vector<8x1xf32>
    %83 = vector.shape_cast %20 : vector<1x32xi1> to vector<1x32xi1>
    %84 = vector.broadcast %83 : vector<1x32xi1> to vector<8x32xi1>
    %85 = vector.shape_cast %82 : vector<8x1xf32> to vector<8x1xf32>
    %86 = vector.broadcast %85 : vector<8x1xf32> to vector<8x32xf32>
    %87 = vector.shape_cast %80 : vector<8x1xf32> to vector<8x1xf32>
    %88 = vector.broadcast %87 : vector<8x1xf32> to vector<8x32xf32>
    %89 = arith.select %84, %86, %88 : vector<8x32xi1>, vector<8x32xf32>
    %90 = vector.shape_cast %89 : vector<8x32xf32> to vector<8x1x32xf32>
    %91 = vector.broadcast %90 : vector<8x1x32xf32> to vector<8x8x32xf32>
    %92 = vector.broadcast %62 : vector<1x8x32xf32> to vector<8x8x32xf32>
    %93 = arith.mulf %91, %92 : vector<8x8x32xf32>
    %94 = arith.addf %58, %93 : vector<8x8x32xf32>
    %c0_19 = arith.constant 0 : index
    %c2 = arith.constant 2 : index
    %c0_20 = arith.constant 0 : index
    %c0_21 = arith.constant 0 : index
    %95 = vector.load %arg2[%c0_19, %c2, %c0_20, %c0_21] : memref<1x4x8x16xf32, #tpu.memory_space<vmem>>, vector<1x1x8x16xf32>
    %96 = vector.shape_cast %95 : vector<1x1x8x16xf32> to vector<8x16xf32>
    %cst_22 = arith.constant dense<0.000000e+00> : vector<8x32xf32>
    %97 = tpu.matmul %96, %0, %cst_22 {dimension_numbers = #tpu.dot_dimension_numbers<[1], [0], [0], [1], [0, 0, 1, 1], [], []>, precision = #tpu.contract_precision<fp32>} : vector<8x16xf32>, vector<16x32xf32>, vector<8x32xf32> -> vector<8x32xf32>
    %98 = vector.shape_cast %97 : vector<8x32xf32> to vector<1x8x32xf32>
    %99 = vector.extract_strided_slice %1 {offsets = [0, 0, 0, 2], sizes = [1, 1, 8, 1], strides = [1, 1, 1, 1]} : vector<2x2x8x4xf32> to vector<1x1x8x1xf32>
    %100 = vector.shape_cast %99 : vector<1x1x8x1xf32> to vector<8x1xf32>
    %101 = vector.extract_strided_slice %1 {offsets = [0, 1, 0, 2], sizes = [1, 1, 8, 1], strides = [1, 1, 1, 1]} : vector<2x2x8x4xf32> to vector<1x1x8x1xf32>
    %102 = vector.shape_cast %101 : vector<1x1x8x1xf32> to vector<8x1xf32>
    %103 = vector.shape_cast %20 : vector<1x32xi1> to vector<1x32xi1>
    %104 = vector.broadcast %103 : vector<1x32xi1> to vector<8x32xi1>
    %105 = vector.shape_cast %102 : vector<8x1xf32> to vector<8x1xf32>
    %106 = vector.broadcast %105 : vector<8x1xf32> to vector<8x32xf32>
    %107 = vector.shape_cast %100 : vector<8x1xf32> to vector<8x1xf32>
    %108 = vector.broadcast %107 : vector<8x1xf32> to vector<8x32xf32>
    %109 = arith.select %104, %106, %108 : vector<8x32xi1>, vector<8x32xf32>
    %110 = vector.shape_cast %109 : vector<8x32xf32> to vector<8x1x32xf32>
    %111 = vector.broadcast %110 : vector<8x1x32xf32> to vector<8x8x32xf32>
    %112 = vector.broadcast %98 : vector<1x8x32xf32> to vector<8x8x32xf32>
    %113 = arith.mulf %111, %112 : vector<8x8x32xf32>
    %114 = arith.addf %78, %113 : vector<8x8x32xf32>
    %115 = vector.extract_strided_slice %1 {offsets = [1, 0, 0, 2], sizes = [1, 1, 8, 1], strides = [1, 1, 1, 1]} : vector<2x2x8x4xf32> to vector<1x1x8x1xf32>
    %116 = vector.shape_cast %115 : vector<1x1x8x1xf32> to vector<8x1xf32>
    %117 = vector.extract_strided_slice %1 {offsets = [1, 1, 0, 2], sizes = [1, 1, 8, 1], strides = [1, 1, 1, 1]} : vector<2x2x8x4xf32> to vector<1x1x8x1xf32>
    %118 = vector.shape_cast %117 : vector<1x1x8x1xf32> to vector<8x1xf32>
    %119 = vector.shape_cast %20 : vector<1x32xi1> to vector<1x32xi1>
    %120 = vector.broadcast %119 : vector<1x32xi1> to vector<8x32xi1>
    %121 = vector.shape_cast %118 : vector<8x1xf32> to vector<8x1xf32>
    %122 = vector.broadcast %121 : vector<8x1xf32> to vector<8x32xf32>
    %123 = vector.shape_cast %116 : vector<8x1xf32> to vector<8x1xf32>
    %124 = vector.broadcast %123 : vector<8x1xf32> to vector<8x32xf32>
    %125 = arith.select %120, %122, %124 : vector<8x32xi1>, vector<8x32xf32>
    %126 = vector.shape_cast %125 : vector<8x32xf32> to vector<8x1x32xf32>
    %127 = vector.broadcast %126 : vector<8x1x32xf32> to vector<8x8x32xf32>
    %128 = vector.broadcast %98 : vector<1x8x32xf32> to vector<8x8x32xf32>
    %129 = arith.mulf %127, %128 : vector<8x8x32xf32>
    %130 = arith.addf %94, %129 : vector<8x8x32xf32>
    %c0_23 = arith.constant 0 : index
    %c3 = arith.constant 3 : index
    %c0_24 = arith.constant 0 : index
    %c0_25 = arith.constant 0 : index
    %131 = vector.load %arg2[%c0_23, %c3, %c0_24, %c0_25] : memref<1x4x8x16xf32, #tpu.memory_space<vmem>>, vector<1x1x8x16xf32>
    %132 = vector.shape_cast %131 : vector<1x1x8x16xf32> to vector<8x16xf32>
    %cst_26 = arith.constant dense<0.000000e+00> : vector<8x32xf32>
    %133 = tpu.matmul %132, %0, %cst_26 {dimension_numbers = #tpu.dot_dimension_numbers<[1], [0], [0], [1], [0, 0, 1, 1], [], []>, precision = #tpu.contract_precision<fp32>} : vector<8x16xf32>, vector<16x32xf32>, vector<8x32xf32> -> vector<8x32xf32>
    %134 = vector.shape_cast %133 : vector<8x32xf32> to vector<1x8x32xf32>
    %135 = vector.extract_strided_slice %1 {offsets = [0, 0, 0, 3], sizes = [1, 1, 8, 1], strides = [1, 1, 1, 1]} : vector<2x2x8x4xf32> to vector<1x1x8x1xf32>
    %136 = vector.shape_cast %135 : vector<1x1x8x1xf32> to vector<8x1xf32>
    %137 = vector.extract_strided_slice %1 {offsets = [0, 1, 0, 3], sizes = [1, 1, 8, 1], strides = [1, 1, 1, 1]} : vector<2x2x8x4xf32> to vector<1x1x8x1xf32>
    %138 = vector.shape_cast %137 : vector<1x1x8x1xf32> to vector<8x1xf32>
    %139 = vector.shape_cast %20 : vector<1x32xi1> to vector<1x32xi1>
    %140 = vector.broadcast %139 : vector<1x32xi1> to vector<8x32xi1>
    %141 = vector.shape_cast %138 : vector<8x1xf32> to vector<8x1xf32>
    %142 = vector.broadcast %141 : vector<8x1xf32> to vector<8x32xf32>
    %143 = vector.shape_cast %136 : vector<8x1xf32> to vector<8x1xf32>
    %144 = vector.broadcast %143 : vector<8x1xf32> to vector<8x32xf32>
    %145 = arith.select %140, %142, %144 : vector<8x32xi1>, vector<8x32xf32>
    %146 = vector.shape_cast %145 : vector<8x32xf32> to vector<8x1x32xf32>
    %147 = vector.broadcast %146 : vector<8x1x32xf32> to vector<8x8x32xf32>
    %148 = vector.broadcast %134 : vector<1x8x32xf32> to vector<8x8x32xf32>
    %149 = arith.mulf %147, %148 : vector<8x8x32xf32>
    %150 = arith.addf %114, %149 : vector<8x8x32xf32>
    %151 = vector.extract_strided_slice %1 {offsets = [1, 0, 0, 3], sizes = [1, 1, 8, 1], strides = [1, 1, 1, 1]} : vector<2x2x8x4xf32> to vector<1x1x8x1xf32>
    %152 = vector.shape_cast %151 : vector<1x1x8x1xf32> to vector<8x1xf32>
    %153 = vector.extract_strided_slice %1 {offsets = [1, 1, 0, 3], sizes = [1, 1, 8, 1], strides = [1, 1, 1, 1]} : vector<2x2x8x4xf32> to vector<1x1x8x1xf32>
    %154 = vector.shape_cast %153 : vector<1x1x8x1xf32> to vector<8x1xf32>
    %155 = vector.shape_cast %20 : vector<1x32xi1> to vector<1x32xi1>
    %156 = vector.broadcast %155 : vector<1x32xi1> to vector<8x32xi1>
    %157 = vector.shape_cast %154 : vector<8x1xf32> to vector<8x1xf32>
    %158 = vector.broadcast %157 : vector<8x1xf32> to vector<8x32xf32>
    %159 = vector.shape_cast %152 : vector<8x1xf32> to vector<8x1xf32>
    %160 = vector.broadcast %159 : vector<8x1xf32> to vector<8x32xf32>
    %161 = arith.select %156, %158, %160 : vector<8x32xi1>, vector<8x32xf32>
    %162 = vector.shape_cast %161 : vector<8x32xf32> to vector<8x1x32xf32>
    %163 = vector.broadcast %162 : vector<8x1x32xf32> to vector<8x8x32xf32>
    %164 = vector.broadcast %134 : vector<1x8x32xf32> to vector<8x8x32xf32>
    %165 = arith.mulf %163, %164 : vector<8x8x32xf32>
    %166 = arith.addf %130, %165 : vector<8x8x32xf32>
    %c0_27 = arith.constant 0 : index
    %c0_28 = arith.constant 0 : index
    %167 = vector.load %arg4[%c0_27, %c0_28] : memref<8x1xf32, #tpu.memory_space<vmem>>, vector<8x1xf32>
    %cst_29 = arith.constant 1.000000e+00 : f32
    %168 = vector.broadcast %cst_29 : f32 to vector<1x32xf32>
    %169 = vector.broadcast %167 : vector<8x1xf32> to vector<8x32xf32>
    %170 = vector.broadcast %168 : vector<1x32xf32> to vector<8x32xf32>
    %171 = arith.mulf %169, %170 : vector<8x32xf32>
    %172 = vector.shape_cast %171 : vector<8x32xf32> to vector<8x1x32xf32>
    %173 = vector.broadcast %172 : vector<8x1x32xf32> to vector<8x8x32xf32>
    %174 = arith.addf %150, %173 : vector<8x8x32xf32>
    %c0_30 = arith.constant 0 : index
    %c0_31 = arith.constant 0 : index
    %c0_32 = arith.constant 0 : index
    %c0_33 = arith.constant 0 : index
    %175 = vector.load %arg6[%c0_30, %c0_31, %c0_32, %c0_33] : memref<1x8x8x64xf32, #tpu.memory_space<vmem>>, vector<1x8x8x32xf32>
    %176 = vector.shape_cast %175 : vector<1x8x8x32xf32> to vector<8x8x32xf32>
    %177 = vector.shape_cast %174 : vector<8x8x32xf32> to vector<1x8x8x32xf32>
    tpu.vector_store %arg6[%c0_30, %c0_31, %c0_32, %c0_33], %177 {strides = array<i32>} : memref<1x8x8x64xf32, #tpu.memory_space<vmem>>, vector<1x8x8x32xf32>,
    %178 = vector.shape_cast %171 : vector<8x32xf32> to vector<8x1x32xf32>
    %179 = vector.broadcast %178 : vector<8x1x32xf32> to vector<8x8x32xf32>
    %180 = arith.addf %166, %179 : vector<8x8x32xf32>
    %c0_34 = arith.constant 0 : index
    %c0_35 = arith.constant 0 : index
    %c0_36 = arith.constant 0 : index
    %c32 = arith.constant 32 : index
    %181 = vector.load %arg6[%c0_34, %c0_35, %c0_36, %c32] : memref<1x8x8x64xf32, #tpu.memory_space<vmem>>, vector<1x8x8x32xf32>
    %182 = vector.shape_cast %181 : vector<1x8x8x32xf32> to vector<8x8x32xf32>
    %183 = vector.shape_cast %180 : vector<8x8x32xf32> to vector<1x8x8x32xf32>
    tpu.vector_store %arg6[%c0_34, %c0_35, %c0_36, %c32], %183 {strides = array<i32>} : memref<1x8x8x64xf32, #tpu.memory_space<vmem>>, vector<1x8x8x32xf32>,
    return
  }
  func.func @transform_0(%arg0: i32, %arg1: i32) -> (i32, i32, i32, i32) {
    %c0_i32 = arith.constant 0 : i32
    %c0_i32_0 = arith.constant 0 : i32
    %c0_i32_1 = arith.constant 0 : i32
    return %arg0, %c0_i32, %arg1, %c0_i32_0 : i32, i32, i32, i32
  }
  func.func @transform_1(%arg0: i32, %arg1: i32) -> (i32, i32, i32, i32) {
    %c0_i32 = arith.constant 0 : i32
    %c0_i32_0 = arith.constant 0 : i32
    %c0_i32_1 = arith.constant 0 : i32
    %c0_i32_2 = arith.constant 0 : i32
    %c0_i32_3 = arith.constant 0 : i32
    return %c0_i32, %c0_i32_0, %c0_i32_1, %c0_i32_2 : i32, i32, i32, i32
  }
  func.func @transform_2(%arg0: i32, %arg1: i32) -> (i32, i32) {
    %c0_i32 = arith.constant 0 : i32
    %c0_i32_0 = arith.constant 0 : i32
    %c0_i32_1 = arith.constant 0 : i32
    return %c0_i32, %c0_i32_0 : i32, i32
  }
  func.func @transform_3(%arg0: i32, %arg1: i32) -> (i32, i32) {
    %c0_i32 = arith.constant 0 : i32
    %c0_i32_0 = arith.constant 0 : i32
    %c0_i32_1 = arith.constant 0 : i32
    return %c0_i32, %c0_i32_0 : i32, i32
  }
  func.func @transform_4(%arg0: i32, %arg1: i32) -> (i32, i32, i32, i32) {
    %c0_i32 = arith.constant 0 : i32
    %c0_i32_0 = arith.constant 0 : i32
    %c0_i32_1 = arith.constant 0 : i32
    return %arg0, %c0_i32, %arg1, %c0_i32_0 : i32, i32, i32, i32
  }
}

</mosaic_0001>

<bundles_post_ra>
// kernel: upsample_forward.1
= control target key start
LH: loop header
LB: loop body
LE: loop exit
PB: predicated region body
PF: predicated region fallthrough
CT: control target
= control target key end

     0   :  { %9 = vsyncpa [#allocation3], 0  ;;  %s4820_s0 = inlined_call_operand.hbm [shape: f32[2,4,16,16], index: 0, kind: input, shape index: {}]   ;;  %s4821_s1 = inlined_call_operand.vmem [shape: f32[2,2,8,4], index: 1, kind: input, shape index: {}]   ;;  %s4822_s2 = inlined_call_operand.vmem [shape: f32[8,1], index: 2, kind: input, shape index: {}]   ;;  %s4823_s3 = inlined_call_operand.vmem [shape: f32[16,32], index: 3, kind: input, shape index: {}]   ;;  %s4824_s4 = inlined_call_operand.vmem [shape: f32[2,8,16,64], index: 4, kind: output, shape index: {}]  }
   0x1   :  { %11 = vsyncpa [#allocation3 + $0x1], 0  ;;  %s3894_s15 = smov 0   ;;  %s3896_s16 = smov 0  }
   0x2   :  { %s3898_s17 = smov 0   ;;  %s3900_s18 = smov 0  }
   0x3   :  { %s3902_s19 = smov 0   ;;  %s3904_s20 = smov 0  }
   0x4   :  { %s3906_s21 = smov 0   ;;  %s3908_s22 = smov 0  }
   0x5 LB: > { %s3291_s23 = sadd.s32 4294967295, %s3854_s22   ;;  %s26_s24 = sadd.s32 1, %s3846_s20  ;;  %s3854_s22 = sphi %s3908_s22, %s17_s22   ;;  %s3850_s21 = sphi %s3906_s21, %s4866_s21   ;;  %s3846_s20 = sphi %s3904_s20, %s4865_s20   ;;  %s3842_s19 = sphi %s3902_s19, %s4864_s19   ;;  %s3838_s18 = sphi %s3900_s18, %s4863_s18   ;;  %s3834_s17 = sphi %s3898_s17, %s4862_s17   ;;  %s3830_s16 = sphi %s3896_s16, %s4861_s16   ;;  %s3826_s15 = sphi %s3894_s15, %s4860_s15  }
   0x6   : > { %p27_p0 = scmp.ge.s32.totalorder %s26_s24, 2  ;;  %s29_s25 = sadd.s32 1, %s3850_s21 }
   0x7   : > { %s38_s26 = sadd.s32 1, %s3834_s17  ;;  %p45_p1 = scmp.ne.s32.totalorder %s3834_s17, %s3830_s16 }
   0x8   : > { %s4868_s24 = smov (%p27_p0, %s26_s24), 0  ;;  %s4870_s25 = smov (!%p27_p0, %s29_s25), %s3850_s21 }
   0x9   : > { %s34_s27 = ssub.s32 %s3846_s20, %s4868_s24  ;;  %p46_p2 = scmp.eq.s32.totalorder %s3854_s22, 0 }
   0xa   : > { %p31_p3 = scmp.ge.s32.totalorder %s4870_s25, 2  ;;  %p51_p4 = scmp.ne.s32.totalorder %s3830_s16, %s3826_s15 }
   0xb   : > { %p3948_p5 = por %p46_p2, %p45_p1  ;;  %p52_p6 = scmp.eq.s32.totalorder %s3291_s23, 0 }
   0xc   : > { %s4872_s25 = smov (%p31_p3, %s4870_s25), 0  ;;  %p140_p8 = scmp.eq.s32.totalorder %s3291_s23, 3 }
   0xd   : > { %p3954_p7 = por %p52_p6, %p51_p4  ;;  %s33_s30 = ssub.s32 %s3850_s21, %s4872_s25 }
   0xe   : > { %s35_s5 = sor.u32 %s34_s27, %s33_s30  ;;  %p3963_p9 = por %p140_p8, %p45_p1 }
   0xf   : > { %p36_p10 = scmp.eq.s32.totalorder %s35_s5, 0  ;;  %p3667_p11 = scmp.lt.s32.totalorder %s3854_s22, 4 }
  0x10   : > { %s4829_s6 = scalar_select %p3963_p9, 1, 0 }
  0x11   : > { %s175_s7 = sand.u32 1, %s3834_s17   ;;  %s3296_s8 = sshll.u32 %s3850_s21, 3 }
  0x12   : > { %s3971_s9 = scalar_select %p36_p10, %s3834_s17, %s38_s26  }
  0x13   : > { %s3295_s10 = sshll.u32 %s175_s7, 5  ;;  %s184_s11 = sadd.s32 %s3846_s20, %s3296_s8 }
  0x14   : > { %s3297_s12 = sshll.u32 %s184_s11, 7  ;;  %s179_s13 = scalar_lea.vmem [#allocation2], %s3295_s10 }
  0x15   : > { %s187_s14 = sshll.u32 %s179_s13, 4  ;;  %s3977_s27 = scalar_lea.hbm %s4820_s0, %s3297_s12  ;;  %s3979_s14 = int_to_ptr.vmem [resolvable:$true] %s187_s14 }
  0x16   : > { %p3983_p12 = pnand %p3667_p11, %p3948_p5  ;;  %s3988_s30 = scalar_lea.sflag [#allocation3], %s175_s7 }
  0x17   : > { %s3758_s5 = scalar_lea.hbm %s3977_s27, 512  ;;  %s3763_s28 = scalar_lea.hbm %s4820_s0, 2048 }
  0x18   : > { %p3759_p0 = scmp.ne.s32.totalorder %s3977_s27, %s3758_s5  ;;  %p3760_p1 = pneg %p3983_p12 }
  0x19   : > { %p3764_p4 = scmp.lt.u32.totalorder %s3977_s27, %s4820_s0  ;;  %p3765_p5 = scmp.lt.u32.totalorder %s3763_s28, %s3758_s5 }
  0x1a   : > { %p3761_p2 = pnand %p3760_p1, %p3759_p0  ;;  %p3767_p8 = scmp.lt.u32.totalorder %s3758_s5, %s3977_s27 }
  0x1b   : > { %p3766_p6 = por %p3765_p5, %p3764_p4 }
  0x1c   : > { %p3762_p3 = pneg %p3761_p2 }
  0x1d   : > { %p3768_p10 = por %p3767_p8, %p3766_p6 }
  0x1f   : > { %p3769_p11 = pnand %p3768_p10, %p3762_p3 }
  0x21   : > { %3772 = shalt.err (!%p3769_p11)
}
  0x22   : > { %s3773_s7 = scalar_lea.vmem %s3979_s14, 512  ;;  %s3856_s13 = smov [#allocation2]  }
  0x23   : > { %p3774_p0 = scmp.ne.s32.totalorder %s3979_s14, %s3773_s7  ;;  %s3778_s15 = sshll.u32 %s3856_s13, 4  ;;  %s3779_s15 = int_to_ptr.vmem [resolvable:$false] %s3778_s15 }
  0x24   : > { %s3780_s23 = scalar_lea.vmem %s3779_s15, 1024  ;;  %p3781_p9 = scmp.lt.s32.totalorder %s3979_s14, %s3779_s15 }
  0x25   : > { %p3776_p2 = pnand %p3774_p0, %p3760_p1  ;;  %p3782_p4 = scmp.lt.s32.totalorder %s3780_s23, %s3773_s7 }
  0x27   : > { %p3777_p13 = pneg %p3776_p2  ;;  %p3783_p5 = por %p3782_p4, %p3781_p9 }
  0x29   : > { %p3784_p6 = pnand %p3783_p5, %p3777_p13 }
  0x2b   : > { %3787 = shalt.err (!%p3784_p6)
}
  0x2c   : > { %s3857_s5 = smov 256   ;;  %s3858_s8 = smov 128  }
  0x2d   : > { %s3859_s10 = smov 8   ;;  %p195_p1 = scmp.lt.s32.totalorder %s3854_s22, 5 }
  0x2e   : > { %3666 = dma.hbm_to_vmem [thread:$0]  (!%p3983_p12), %s3977_s27, 512, %s3979_s14, %s3988_s30, %s3857_s5, %s3858_s8, %s3859_s10  }
  0x2f   : > { %p4831_p3 = scmp.ge.s32.totalorder %s3854_s22, 1 }
  0x31   : > { %p196_p8 = pnand %p4831_p3, %p195_p1 }
  0x33   : > { %199 = sbr.rel (%p196_p8) target bundleno = 523 (0x20b), region = 36 }
  0x3a   : > { %s4020_s28 = sand.u32 1, %s3830_s16  }
  0x3b   : > { %s3299_s11 = sshll.u32 %s4020_s28, 5  ;;  %s202_s12 = scalar_lea.sflag [#allocation3], %s4020_s28 }
  0x3c   : > { %s4024_s7 = scalar_lea.vmem [#allocation2], %s3299_s11 }
  0x3d   : > { %3821 = dma.done.wait (%p3954_p7), %s202_s12, 512  }
  0x3e   : > { %3823 = vsyncadd (%p3954_p7), %s202_s12, 4294966784  ;;  %v3860_v0 = vmov 0.0|0.0   ;;  %vm3861_vm0 = vmmov 0   ;;  %v3862_v1 = vmov 0.0   ;;  %v3863_v2 = vmov 1   ;;  %v229_v4 = vld [vmem:[%s4823_s3] sm:$0xff] }
  0x3f   : > { %3549 = vmatprep.subr.bf16.mxu0 %v3860_v0  ;;  %3567 = vmatprep.subr.bf16.mxu1 %v3860_v0  ;;  %v3864_v3 = vmov 0   ;;  %vm251_vm1 = vcmask 130048   ;;  %v230_v5 = vld [vmem:[%s4823_s3 + $0x8] sm:$0xff]  ;;  %v250_v6 = vld [vmem:[%s4024_s7] sm:$0xff]  ;;  %v256_v7 = vand.u32 4294901760, %v229_v4  ;;  %v234_v13 = vld [vmem:[%s4821_s1 + $0x18] sm:$0xff]  ;;  %v235_v60 = vlaneseq }
  0x40   : > { %3385 = vmatprep.mubr.msk.f32.mxu0 %vm3861_vm0, %v3862_v1  ;;  %3427 = vmatprep.mubr.msk.f32.mxu1 %vm3861_vm0, %v3862_v1  ;;  %v259_v8 = vand.u32 4294901760, %v230_v5  ;;  %v253_v9 = vsel %vm251_vm1, %v250_v6, 0  ;;  %v3301_v10 = vld [vmem:[%s4024_s7 + $0x8] sm:$0xff]  ;;  %v233_v19 = vld [vmem:[%s4821_s1 + $0x10] sm:$0xff]  ;;  %v3865_v34 = vmov 2   ;;  %v3866_v35 = vmov 3  }
  0x41   : > { %3745 = vset.pattern.permute.xlu1 %v3863_v2  ;;  %3744 = vset.pattern.permute.xlu0 %v3864_v3  ;;  %v4047_v11 = vand.u32 4294901760, %v253_v9  ;;  %v953_v12 = vsel %vm251_vm1, %v3301_v10, 0  ;;  %v4057_v16 = vsub.f32 %v229_v4, %v256_v7  ;;  %v3032_v37 = vld [vmem:[%s4822_s2] sm:$0xff]  ;;  %v4120_v38 = vld [vmem:[%s4821_s1 + $0x8] sm:$0xff]  ;;  %v3302_v39 = vld [vmem:[%s4024_s7 + $0x10] sm:$0xff]  ;;  %v236_v63 = vand.u32 127, %v235_v60 }
  0x42   : > { %v4053_v14 = vpack.c.bf16 %v259_v8, %v256_v7  ;;  %v4055_v15 = vand.u32 4294901760, %v953_v12  ;;  %v4059_v17 = vsub.f32 %v230_v5, %v259_v8  ;;  %1530 = vperm.xlu1 %3745, %v234_v13   ;;  %835 = vperm.xlu0 %3744, %v234_v13   ;;  %v3303_v40 = vld [vmem:[%s4024_s7 + $0x18] sm:$0xff]  ;;  %v231_v41 = vld [vmem:[%s4821_s1] sm:$0xff]  ;;  %v1647_v43 = vsel %vm251_vm1, %v3302_v39, 0  ;;  %s3300_s7 = sshll.u32 %s4020_s28, 6  ;;  %s3868_s28 = smov 32  }
  0x43   : > { %v4062_v18 = vsub.f32 %v253_v9, %v4047_v11  ;;  %v335_v21 = vand.u32 4294901760, %v4057_v16  ;;  %v2341_v44 = vsel %vm251_vm1, %v3303_v40, 0  ;;  %v4140_v45 = vand.u32 4294901760, %v1647_v43  ;;  %s4684_s14 = scalar_lea.vmem [#allocation4], %s3300_s7  ;;  %p4859_p7 = scmp.ne.s32.totalorder %s4829_s6, 0 }
  0x44   : > { %3551 = vmatpush3.bf16.msra.mxu0 %v4053_v14  ;;  %3569 = vmatpush3.bf16.msra.mxu1 %v4053_v14  ;;  %v4070_v20 = vsub.f32 %v953_v12, %v4055_v15  ;;  %v342_v22 = vand.u32 4294901760, %v4059_v17  ;;  %v4097_v36 = vpack.c.bf16 %v4059_v17, %v4057_v16  ;;  %v4144_v46 = vand.u32 4294901760, %v2341_v44  ;;  %s3305_s27 = sshll.u32 (%p4859_p7), %s3842_s19, 4 }
  0x45   : > { %v324_v23 = vand.u32 4294901760, %v4062_v18  ;;  %3552 = vmatprep.subr.bf16.mxu0 %v3860_v0  ;;  %3570 = vmatprep.subr.bf16.mxu1 %v3860_v0  ;;  %v336_v25 = vsub.f32 %v4057_v16, %v335_v21  ;;  %v1717_v47 = vsub.f32 %v1647_v43, %v4140_v45  ;;  %v4235_v6 = vshrl.u32 %v235_v60, 7  ;;  %s3151_s26 = sadd.s32 (%p4859_p7), %s3838_s18, %s3305_s27 }
  0x46   : > { %v1024_v24 = vand.u32 4294901760, %v4070_v20  ;;  %v343_v26 = vsub.f32 %v4059_v17, %v342_v22  ;;  %1534 = vperm.xlu1 %3745, %v233_v19   ;;  %840 = vperm.xlu0 %3744, %v233_v19   ;;  %v4135_v42 = vpack.c.bf16 %v342_v22, %v335_v21  ;;  %v2411_v48 = vsub.f32 %v2341_v44, %v4144_v46  ;;  %s3306_s6 = sshll.u32 (%p4859_p7), %s3151_s26, 3 }
  0x47   : > { %v325_v27 = vsub.f32 %v4062_v18, %v324_v23  ;;  %v337_v29 = vand.u32 4294901760, %v336_v25  ;;  %v1718_v49 = vand.u32 4294901760, %v1717_v47  ;;  %vm3085_vm3 = vcmask 261120   ;;  %s3153_s15 = scalar_lea.vmem (%p4859_p7), %s4824_s4, %s3306_s6 }
  0x48   : > { %v1025_v28 = vsub.f32 %v4070_v20, %v1024_v24  ;;  %v344_v30 = vand.u32 4294901760, %v343_v26  ;;  %v2412_v50 = vand.u32 4294901760, %v2411_v48  ;;  %vm3134_vm4 = vcmask 523520  }
  0x49   : > { %v326_v31 = vand.u32 4294901760, %v325_v27  ;;  %v1719_v51 = vsub.f32 %v1717_v47, %v1718_v49 }
  0x4a   : > { %v1026_v32 = vand.u32 4294901760, %v1025_v28  ;;  %v4082_v33 = vpack.c.bf16 %v344_v30, %v337_v29  ;;  %3747 = vset.pattern.permute.xlu1 %v3865_v34  ;;  %3746 = vset.pattern.permute.xlu0 %v3865_v34  ;;  %v2413_v52 = vsub.f32 %v2411_v48, %v2412_v50  ;;  %v4262_v28 = vsub.s32 0, %v4235_v6 }
  0x4b   : > { %3386 = vmatmul.mubr.f32.vlgmr.msra.gmra.mrb[0].mxu0 %v326_v31  ;;  %2228 = vperm.xlu1 %3747, %v233_v19   ;;  %v1720_v53 = vand.u32 4294901760, %v1719_v51 }
  0x4c   : > { %3428 = vmatmul.mubr.f32.vlgmr.msra.gmra.mrb[0].mxu1 %v1026_v32  ;;  %3554 = vmatpush3.bf16.msra.mxu0 %v4082_v33  ;;  %v2414_v54 = vand.u32 4294901760, %v2413_v52 }
  0x4d   : > { %3572 = vmatpush3.bf16.msra.mxu1 %v4082_v33  ;;  %3392 = vmatprep.mubr.msk.f32.mxu0 %vm3861_vm0, %v3862_v1 }
  0x4e   : > { %3434 = vmatprep.mubr.msk.f32.mxu1 %vm3861_vm0, %v3862_v1  ;;  %3555 = vmatprep.subr.bf16.mxu0 %v3860_v0 }
  0x4f   : > { %3573 = vmatprep.subr.bf16.mxu1 %v3860_v0  ;;  %3748 = vset.pattern.permute.xlu1 %v3866_v35 }
  0x50   : > { %2918 = vperm.xlu1 %3748, %v234_v13   ;;  %2224 = vperm.xlu0 %3746, %v234_v13  }
  0x53   : > { %3393 = vmatmul.mubr.f32.vlgmr.msra.gmra.mrb[0].mxu0 %v4047_v11 }
  0x54   : > { %3435 = vmatmul.mubr.f32.vlgmr.msra.gmra.mrb[0].mxu1 %v4055_v15  ;;  %3557 = vmatpush3.bf16.msra.mxu0 %v4097_v36 }
  0x55   : > { %3575 = vmatpush3.bf16.msra.mxu1 %v4097_v36  ;;  %3399 = vmatprep.mubr.msk.f32.mxu0 %vm3861_vm0, %v3862_v1 }
  0x56   : > { %3441 = vmatprep.mubr.msk.f32.mxu1 %vm3861_vm0, %v3862_v1  ;;  %3558 = vmatprep.subr.bf16.mxu0 %v3860_v0 }
  0x57   : > { %3576 = vmatprep.subr.bf16.mxu1 %v3860_v0  ;;  %3750 = vset.pattern.permute.xlu1 %v3864_v3 }
  0x58   : > { %3035 = vperm.xlu1 %3750, %v3032_v37   ;;  %3749 = vset.pattern.permute.xlu0 %v3866_v35 }
  0x59   : > { %2922 = vperm.xlu0 %3749, %v233_v19  }
  0x5b   : > { %3400 = vmatmul.mubr.f32.vlgmr.msra.gmra.mrb[0].mxu0 %v4062_v18 }
  0x5c   : > { %3442 = vmatmul.mubr.f32.vlgmr.msra.gmra.mrb[0].mxu1 %v4070_v20  ;;  %3560 = vmatpush3.bf16.msra.mxu0 %v4053_v14 }
  0x5d   : > { %3578 = vmatpush3.bf16.msra.mxu1 %v4053_v14  ;;  %3406 = vmatprep.mubr.msk.f32.mxu0 %vm3861_vm0, %v3862_v1 }
  0x5e   : > { %3448 = vmatprep.mubr.msk.f32.mxu1 %vm3861_vm0, %v3862_v1  ;;  %3561 = vmatprep.subr.bf16.mxu0 %v3860_v0 }
  0x5f   : > { %3579 = vmatprep.subr.bf16.mxu1 %v3860_v0  ;;  %718 = vperm.xlu1 %3750, %v4120_v38  }
  0x60   : > { %3751 = vset.pattern.permute.xlu0 %v3864_v3 }
  0x61   : > { %723 = vperm.xlu0 %3751, %v231_v41  }
  0x63   : > { %3407 = vmatmul.mubr.f32.vlgmr.msra.gmra.mrb[0].mxu0 %v324_v23  ;;  %3752 = vset.pattern.permute.xlu1 %v3863_v2 }
  0x64   : > { %3449 = vmatmul.mubr.f32.vlgmr.msra.gmra.mrb[0].mxu1 %v1024_v24  ;;  %3563 = vmatpush3.bf16.msra.mxu0 %v4135_v42 }
  0x65   : > { %3581 = vmatpush3.bf16.msra.mxu1 %v4135_v42  ;;  %3413 = vmatprep.mubr.msk.f32.mxu0 %vm3861_vm0, %v3862_v1 }
  0x66   : > { %3455 = vmatprep.mubr.msk.f32.mxu1 %vm3861_vm0, %v3862_v1  ;;  %3564 = vmatprep.subr.bf16.mxu0 %v3860_v0 }
  0x67   : > { %3582 = vmatprep.subr.bf16.mxu1 %v3860_v0  ;;  %1415 = vperm.xlu1 %3752, %v4120_v38  }
  0x68   : > { %3753 = vset.pattern.permute.xlu0 %v3865_v34 }
  0x69   : > { %2109 = vperm.xlu0 %3753, %v4120_v38  }
  0x6b   : > { %3414 = vmatmul.mubr.f32.vlgmr.msra.gmra.mrb[0].mxu0 %v4047_v11  ;;  %1419 = vperm.xlu1 %3752, %v231_v41  }
  0x6c   : > { %3456 = vmatmul.mubr.f32.vlgmr.msra.gmra.mrb[0].mxu1 %v4055_v15  ;;  %3566 = vmatpush3.bf16.msra.mxu0 %v4053_v14 }
  0x6d   : > { %3584 = vmatpush3.bf16.msra.mxu1 %v4053_v14  ;;  %3420 = vmatprep.mubr.msk.f32.mxu0 %vm3861_vm0, %v3862_v1 }
  0x6e   : > { %3462 = vmatprep.mubr.msk.f32.mxu1 %vm3861_vm0, %v3862_v1  ;;  %3585 = vmatprep.subr.bf16.mxu0 %v3860_v0 }
  0x6f   : > { %3603 = vmatprep.subr.bf16.mxu1 %v3860_v0  ;;  %3754 = vset.pattern.permute.xlu1 %v3865_v34 }
  0x70   : > { %2113 = vperm.xlu1 %3754, %v231_v41   ;;  %3756 = vset.pattern.permute.xlu0 %v3866_v35 }
  0x71   : > { %2807 = vperm.xlu0 %3756, %v231_v41  }
  0x73   : > { %3421 = vmatmul.mubr.f32.vlgmr.msra.gmra.mrb[0].mxu0 %v4047_v11 }
  0x74   : > { %3463 = vmatmul.mubr.f32.vlgmr.msra.gmra.mrb[0].mxu1 %v4055_v15  ;;  %3587 = vmatpush3.bf16.msra.mxu0 %v4053_v14 }
  0x75   : > { %3605 = vmatpush3.bf16.msra.mxu1 %v4053_v14  ;;  %3469 = vmatprep.mubr.msk.f32.mxu0 %vm3861_vm0, %v3862_v1 }
  0x76   : > { %3511 = vmatprep.mubr.msk.f32.mxu1 %vm3861_vm0, %v3862_v1  ;;  %3588 = vmatprep.subr.bf16.mxu0 %v3860_v0 }
  0x77   : > { %3470 = vmatmul.mubr.f32.vlgmr.msra.gmra.mrb[2].mxu0 %v1720_v53  ;;  %3606 = vmatprep.subr.bf16.mxu1 %v3860_v0 }
  0x78   : > { %3512 = vmatmul.mubr.f32.vlgmr.msra.gmra.mrb[2].mxu1 %v2414_v54  ;;  %3590 = vmatpush3.bf16.msra.mxu0 %v4082_v33 }
  0x79   : > { %3608 = vmatpush3.bf16.msra.mxu1 %v4082_v33  ;;  %3476 = vmatprep.mubr.msk.f32.mxu0 %vm3861_vm0, %v3862_v1 }
  0x7a   : > { %3518 = vmatprep.mubr.msk.f32.mxu1 %vm3861_vm0, %v3862_v1  ;;  %3591 = vmatprep.subr.bf16.mxu0 %v3860_v0 }
  0x7b   : > { %3609 = vmatprep.subr.bf16.mxu1 %v3860_v0  ;;  %3755 = vset.pattern.permute.xlu1 %v3866_v35 }
  0x7c   : > { %2803 = vperm.xlu1 %3755, %v4120_v38   ;;  %3757 = vset.pattern.permute.xlu0 %v3864_v3 }
  0x7f   : > { %3477 = vmatmul.mubr.f32.vlgmr.msra.gmra.mrb[2].mxu0 %v4140_v45 }
  0x80   : > { %3519 = vmatmul.mubr.f32.vlgmr.msra.gmra.mrb[2].mxu1 %v4144_v46  ;;  %3593 = vmatpush3.bf16.msra.mxu0 %v4097_v36 }
  0x81   : > { %3611 = vmatpush3.bf16.msra.mxu1 %v4097_v36  ;;  %3483 = vmatprep.mubr.msk.f32.mxu0 %vm3861_vm0, %v3862_v1 }
  0x82   : > { %3525 = vmatprep.mubr.msk.f32.mxu1 %vm3861_vm0, %v3862_v1  ;;  %3594 = vmatprep.subr.bf16.mxu0 %v3860_v0 }
  0x83   : > { %3612 = vmatprep.subr.bf16.mxu1 %v3860_v0 }
  0x87   : > { %3484 = vmatmul.mubr.f32.vlgmr.msra.gmra.mrb[2].mxu0 %v1717_v47 }
  0x88   : > { %3526 = vmatmul.mubr.f32.vlgmr.msra.gmra.mrb[2].mxu1 %v2411_v48  ;;  %3596 = vmatpush3.bf16.msra.mxu0 %v4053_v14 }
  0x89   : > { %3614 = vmatpush3.bf16.msra.mxu1 %v4053_v14  ;;  %3490 = vmatprep.mubr.msk.f32.mxu0 %vm3861_vm0, %v3862_v1 }
  0x8a   : > { %3532 = vmatprep.mubr.msk.f32.mxu1 %vm3861_vm0, %v3862_v1  ;;  %3597 = vmatprep.subr.bf16.mxu0 %v3860_v0 }
  0x8b   : > { %3615 = vmatprep.subr.bf16.mxu1 %v3860_v0 }
  0x8f   : > { %3491 = vmatmul.mubr.f32.vlgmr.msra.gmra.mrb[2].mxu0 %v1718_v49 }
  0x90   : > { %3533 = vmatmul.mubr.f32.vlgmr.msra.gmra.mrb[2].mxu1 %v2412_v50  ;;  %3599 = vmatpush3.bf16.msra.mxu0 %v4135_v42 }
  0x91   : > { %3617 = vmatpush3.bf16.msra.mxu1 %v4135_v42  ;;  %3497 = vmatprep.mubr.msk.f32.mxu0 %vm3861_vm0, %v3862_v1 }
  0x92   : > { %3539 = vmatprep.mubr.msk.f32.mxu1 %vm3861_vm0, %v3862_v1  ;;  %3600 = vmatprep.subr.bf16.mxu0 %v3860_v0 }
  0x93   : > { %3618 = vmatprep.subr.bf16.mxu1 %v3860_v0  ;;  %v3867_v0 = vmov 1966171168  }
  0x94   : > { %v730_v2 = vunpack.c.l.s4 %v3867_v0 }
  0x96   : > { %v731_v5 = vunpack.c.0.s8 %v730_v2 }
  0x97   : > { %3498 = vmatmul.mubr.f32.vlgmr.msra.gmra.mrb[2].mxu0 %v4140_v45 }
  0x98   : > { %3540 = vmatmul.mubr.f32.vlgmr.msra.gmra.mrb[2].mxu1 %v4144_v46  ;;  %3602 = vmatpush3.bf16.msra.mxu0 %v4053_v14  ;;  %v4244_v10 = vsub.s32 %v731_v5, %v4235_v6 }
  0x99   : > { %3620 = vmatpush3.bf16.msra.mxu1 %v4053_v14  ;;  %3504 = vmatprep.mubr.msk.f32.mxu0 %vm3861_vm0, %v3862_v1 }
  0x9a   : > { %3546 = vmatprep.mubr.msk.f32.mxu1 %vm3861_vm0, %v3862_v1  ;;  %v241_v1 = vand.u32 1, %v236_v63 }
  0x9c   : > { %vm4237_vm2 = vcmp.eq.s32.totalorder %v241_v1, 1 }
  0x9f   : > { %3505 = vmatmul.mubr.f32.vlgmr.msra.gmra.mrb[2].mxu0 %v4140_v45 }
  0xa0   : > { %3547 = vmatmul.mubr.f32.vlgmr.msra.gmra.mrb[2].mxu1 %v4144_v46 }
  0xc1   : > { %v1531_v55 = vpop.permute.xlu1 %1530  ;;  %v836_v58 = vpop.permute.xlu0 %835 }
  0xc5   : > { %v1535_v56 = vpop.permute.xlu1 %1534  ;;  %v841_v61 = vpop.permute.xlu0 %840 }
  0xc6   : > { %v1537_v11 = vsel %vm4237_vm2, %v1531_v55, %v1535_v56  ;;  %v843_v13 = vsel %vm4237_vm2, %v836_v58, %v841_v61 }
  0xc7   : > { %v1539_v12 = vcombine.high %v1537_v11, %v1537_v11  ;;  %v1546_v14 = vrot.slane %v1537_v11, %v4244_v10  ;;  %v845_v17 = vcombine.high %v843_v13, %v843_v13  ;;  %v852_v22 = vrot.slane %v843_v13, %v4244_v10 }
  0xc9   : > { %v1553_v18 = vrot.slane %v1539_v12, %v4244_v10  ;;  %v1554_v20 = vcombine.high %v1546_v14, %v1546_v14  ;;  %v4258_v23 = vrot.slane %v1546_v14, %v4244_v10  ;;  %v859_v24 = vrot.slane %v845_v17, %v4244_v10 }
  0xca   : > { %v4227_v57 = vpop.permute.xlu1 %2228  ;;  %v860_v31 = vcombine.high %v852_v22, %v852_v22  ;;  %v4278_v37 = vrot.slane %v852_v22, %v4244_v10 }
  0xcb   : > { %v1555_v26 = vcombine.high %v1553_v18, %v1553_v18  ;;  %v4265_v29 = vrot.slane %v1553_v18, %v4244_v10  ;;  %v4268_v30 = vrot.slane %v1554_v20, %v4244_v10  ;;  %v1584_v33 = vcombine.high %v4258_v23, %v4258_v23 }
  0xcc   : > { %v861_v34 = vcombine.high %v859_v24, %v859_v24  ;;  %v1591_v42 = vrot.slane %v4258_v23, %v4262_v28  ;;  %v4291_v44 = vrot.slane %v859_v24, %v4244_v10  ;;  %v4294_v45 = vrot.slane %v860_v31, %v4244_v10 }
  0xcd   : > { %v4275_v36 = vrot.slane %v1555_v26, %v4244_v10  ;;  %v1585_v40 = vcombine.high %v4265_v29, %v4265_v29  ;;  %v1586_v41 = vcombine.high %v4268_v30, %v4268_v30  ;;  %v1595_v43 = vrot.slane %v4268_v30, %v4262_v28 }
  0xce   : > { %v4297_v47 = vrot.slane %v1584_v33, %v4262_v28  ;;  %v1607_v48 = vrot.slane %v4265_v29, %v4262_v28  ;;  %v4302_v49 = vrot.slane %v861_v34, %v4244_v10  ;;  %v890_v52 = vcombine.high %v4278_v37, %v4278_v37 }
  0xcf   : > { %v4229_v59 = vpop.permute.xlu1 %2918  ;;  %v4233_v3 = vpop.permute.xlu0 %2224  ;;  %v1587_v51 = vcombine.high %v4275_v36, %v4275_v36  ;;  %v4309_v55 = vrot.slane %v1586_v41, %v4262_v28  ;;  %v1611_v56 = vrot.slane %v4275_v36, %v4262_v28  ;;  %v4314_v58 = vrot.slane %v1585_v40, %v4262_v28 }
  0xd0   : > { %v891_v61 = vcombine.high %v4291_v44, %v4291_v44  ;;  %v892_v63 = vcombine.high %v4294_v45, %v4294_v45  ;;  %v893_v1 = vcombine.high %v4302_v49, %v4302_v49  ;;  %v913_v17 = vrot.slane %v4291_v44, %v4262_v28 }
  0xd1   : > { %v4334_v11 = vrot.slane %v1587_v51, %v4262_v28  ;;  %v917_v20 = vrot.slane %v4302_v49, %v4262_v28  ;;  %v4361_v31 = vsel %vm4237_vm2, %v4233_v3, %v4227_v57 }
  0xd2   : > { %v921_v24 = vrot.slane %v891_v61, %v4262_v28 }
  0xd7   : > { %v4231_v62 = vpop.permute.xlu1 %3035 }
  0xd8   : > { %4832 = vst [vmem:[#allocation6_spill] sm:$0xff] %v4231_v62  ;;  %v4241_v8 = vpop.permute.xlu0 %2922 }
  0xde   : > { %v719_v4 = vpop.permute.xlu1 %718 }
  0xe0   : > { %v724_v15 = vpop.permute.xlu0 %723 }
  0xe1   : > { %v726_v19 = vsel %vm4237_vm2, %v719_v4, %v724_v15  ;;  %v897_v4 = vrot.slane %v4278_v37, %v4262_v28  ;;  %v901_v15 = vrot.slane %v4294_v45, %v4262_v28 }
  0xe2   : > { %v728_v25 = vcombine.high %v726_v19, %v726_v19  ;;  %v735_v32 = vrot.slane %v726_v19, %v4244_v10  ;;  %v909_v19 = vrot.slane %v892_v63, %v4262_v28 }
  0xe4   : > { %v742_v35 = vrot.slane %v728_v25, %v4244_v10  ;;  %v743_v46 = vcombine.high %v735_v32, %v735_v32  ;;  %v751_v60 = vrot.slane %v735_v32, %v4244_v10  ;;  %v4353_v25 = vrot.slane %v893_v1, %v4262_v28 }
  0xe6   : > { %v1416_v9 = vpop.permute.xlu1 %1415  ;;  %v744_v50 = vcombine.high %v742_v35, %v742_v35  ;;  %v4323_v2 = vrot.slane %v743_v46, %v4244_v10  ;;  %v758_v5 = vrot.slane %v742_v35, %v4244_v10  ;;  %v773_v18 = vcombine.high %v751_v60, %v751_v60 }
  0xe7   : > { %v780_v35 = vrot.slane %v751_v60, %v4262_v28 }
  0xe8   : > { %v775_v22 = vcombine.high %v4323_v2, %v4323_v2  ;;  %v774_v26 = vcombine.high %v758_v5, %v758_v5  ;;  %v784_v37 = vrot.slane %v4323_v2, %v4262_v28 }
  0xea   : > { %v1420_v16 = vpop.permute.xlu1 %1419  ;;  %v792_v57 = vrot.slane %v775_v22, %v4262_v28  ;;  %v804_v46 = vrot.slane %v774_v26, %v4262_v28 }
  0xeb   : > { %v1422_v21 = vsel %vm4237_vm2, %v1416_v9, %v1420_v16  ;;  %v4331_v9 = vrot.slane %v744_v50, %v4244_v10  ;;  %v905_v16 = vrot.slane %v890_v52, %v4262_v28 }
  0xec   : > { %v1424_v27 = vcombine.high %v1422_v21, %v1422_v21  ;;  %v1431_v38 = vrot.slane %v1422_v21, %v4244_v10 }
  0xed   : > { %v800_v3 = vrot.slane %v4331_v9, %v4262_v28 }
  0xee   : > { %v1438_v39 = vrot.slane %v1424_v27, %v4244_v10  ;;  %v1439_v53 = vcombine.high %v1431_v38, %v1431_v38  ;;  %v1447_v0 = vrot.slane %v1431_v38, %v4244_v10  ;;  %v776_v27 = vcombine.high %v4331_v9, %v4331_v9 }
  0xef   : > { %v788_v38 = vrot.slane %v773_v18, %v4262_v28  ;;  %v2114_v49 = vpop.permute.xlu1 %2113 }
  0xf0   : > { %v1440_v54 = vcombine.high %v1438_v39, %v1438_v39  ;;  %v1454_v12 = vrot.slane %v1438_v39, %v4244_v10  ;;  %v1461_v13 = vrot.slane %v1439_v53, %v4244_v10  ;;  %v1469_v21 = vcombine.high %v1447_v0, %v1447_v0 }
  0xf1   : > { %v796_v39 = vrot.slane %v758_v5, %v4262_v28  ;;  %v1476_v40 = vrot.slane %v1447_v0, %v4262_v28  ;;  %v808_v50 = vrot.slane %v776_v27, %v4262_v28 }
  0xf2   : > { %v4339_v14 = vrot.slane %v1440_v54, %v4244_v10  ;;  %v1470_v32 = vcombine.high %v1454_v12, %v1454_v12  ;;  %v1471_v33 = vcombine.high %v1461_v13, %v1461_v13  ;;  %v1484_v41 = vrot.slane %v1469_v21, %v4262_v28 }
  0xf3   : > { %v1480_v44 = vrot.slane %v1461_v13, %v4262_v28  ;;  %v1492_v45 = vrot.slane %v1454_v12, %v4262_v28 }
  0xf4   : > { %v1472_v34 = vcombine.high %v4339_v14, %v4339_v14  ;;  %v1488_v51 = vrot.slane %v1471_v33, %v4262_v28  ;;  %v1496_v52 = vrot.slane %v4339_v14, %v4262_v28  ;;  %v1500_v53 = vrot.slane %v1470_v32, %v4262_v28 }
  0xf6   : > { %v1504_v54 = vrot.slane %v1472_v34, %v4262_v28 }
 0x146   : > { %v710_v60 = vpop.f32.mrb[0].mxu0 }
 0x147   : > { %v1410_v61 = vpop.f32.mrb[0].mxu1  ;;  %v3422_v63 = vpop.f32.mrb[1].mxu0  ;;  %v819_v0 = vmul.f32 %v788_v38, %v710_v60  ;;  %v936_v2 = vmul.f32 %v905_v16, %v710_v60  ;;  %v817_v1 = vmul.f32 %v780_v35, %v710_v60  ;;  %v934_v5 = vmul.f32 %v897_v4, %v710_v60 }
 0x148   : > { %v3464_v9 = vpop.f32.mrb[1].mxu1  ;;  %v1515_v12 = vmul.f32 %v1484_v41, %v1410_v61  ;;  %v1630_v13 = vmul.f32 %v4297_v47, %v1410_v61  ;;  %v1513_v18 = vmul.f32 %v1476_v40, %v1410_v61  ;;  %v1628_v14 = vmul.f32 %v1591_v42, %v1410_v61 }
 0x149   : > { %v821_v21 = vmul.f32 %v796_v39, %v710_v60  ;;  %v938_v22 = vmul.f32 %v913_v17, %v710_v60  ;;  %v1517_v26 = vmul.f32 %v1492_v45, %v1410_v61  ;;  %v1632_v27 = vmul.f32 %v1607_v48, %v1410_v61 }
 0x14a   : > { %v4391_v32 = vadd.f32 %v1515_v12, %v819_v0  ;;  %v4393_v16 = vadd.f32 %v1630_v13, %v936_v2  ;;  %v4395_v4 = vadd.f32 %v1513_v18, %v817_v1  ;;  %v4397_v33 = vadd.f32 %v1628_v14, %v934_v5 }
 0x14b   : > { %v4399_v47 = vadd.f32 %v1517_v26, %v821_v21  ;;  %v4401_v34 = vadd.f32 %v1632_v27, %v938_v22  ;;  %v818_v23 = vmul.f32 %v784_v37, %v710_v60  ;;  %v935_v42 = vmul.f32 %v901_v15, %v710_v60 }
 0x14c   : > { %v1514_v17 = vmul.f32 %v1480_v44, %v1410_v61  ;;  %v1629_v29 = vmul.f32 %v1595_v43, %v1410_v61  ;;  %v823_v48 = vmul.f32 %v804_v46, %v710_v60  ;;  %v940_v35 = vmul.f32 %v921_v24, %v710_v60 }
 0x14d   : > { %v1519_v38 = vmul.f32 %v1500_v53, %v1410_v61  ;;  %v1634_v39 = vmul.f32 %v4314_v58, %v1410_v61  ;;  %v820_v40 = vmul.f32 %v792_v57, %v710_v60  ;;  %v937_v41 = vmul.f32 %v909_v19, %v710_v60 }
 0x14e   : > { %v4407_v45 = vadd.f32 %v1514_v17, %v818_v23  ;;  %v4409_v63 = vadd.f32 %v1629_v29, %v935_v42  ;;  %v1516_v0 = vmul.f32 %v1488_v51, %v1410_v61  ;;  %v1631_v37 = vmul.f32 %v4309_v55, %v1410_v61 }
 0x14f   : > { %v4412_v15 = vadd.f32 %v1519_v38, %v823_v48  ;;  %v4414_v44 = vadd.f32 %v1634_v39, %v940_v35  ;;  %v822_v30 = vmul.f32 %v800_v3, %v710_v60  ;;  %v939_v43 = vmul.f32 %v917_v20, %v710_v60  ;;  %v2110_v20 = vpop.permute.xlu0 %2109 }
 0x150   : > { %v4419_v24 = vadd.f32 %v1516_v0, %v820_v40  ;;  %v4421_v58 = vadd.f32 %v1631_v37, %v937_v41  ;;  %v1518_v19 = vmul.f32 %v1496_v52, %v1410_v61  ;;  %v1633_v57 = vmul.f32 %v1611_v56, %v1410_v61 }
 0x151   : > { %v824_v46 = vmul.f32 %v808_v50, %v710_v60  ;;  %v941_v55 = vmul.f32 %v4353_v25, %v710_v60  ;;  %v1520_v51 = vmul.f32 %v1504_v54, %v1410_v61  ;;  %v1635_v53 = vmul.f32 %v4334_v11, %v1410_v61 }
 0x152   : > { %v2233_v3 = vcombine.high %v4361_v31, %v4361_v31  ;;  %v4430_v2 = vadd.f32 %v1518_v19, %v822_v30  ;;  %v4432_v1 = vadd.f32 %v1633_v57, %v939_v43  ;;  %v2240_v52 = vrot.slane %v4361_v31, %v4244_v10  ;;  %v2804_v31 = vpop.permute.xlu1 %2803 }
 0x153   : > { %v4436_v36 = vadd.f32 %v1520_v51, %v824_v46  ;;  %v4438_v56 = vadd.f32 %v1635_v53, %v941_v55  ;;  %v2925_v11 = vsel %vm4237_vm2, %v4229_v59, %v4241_v8  ;;  %v2116_v61 = vsel %vm4237_vm2, %v2110_v20, %v2114_v49  ;;  %v2808_v5 = vpop.permute.xlu0 %2807 }
 0x154   : > { %4835 = vst [vmem:[#allocation7_spill] sm:$0xff] %v4430_v2  ;;  %v2247_v25 = vrot.slane %v2233_v3, %v4244_v10  ;;  %v2248_v50 = vcombine.high %v2240_v52, %v2240_v52  ;;  %v2927_v54 = vcombine.high %v2925_v11, %v2925_v11  ;;  %v4446_v60 = vrot.slane %v2240_v52, %v4244_v10 }
 0x155   : > { %4836 = vst [vmem:[#allocation8_spill] sm:$0xff] %v4436_v36  ;;  %4837 = vst [vmem:[#allocation9_spill] sm:$0xff] %v4438_v56  ;;  %v2934_v9 = vrot.slane %v2925_v11, %v4244_v10  ;;  %v2118_v8 = vcombine.high %v2116_v61, %v2116_v61  ;;  %v2810_v18 = vsel %vm4237_vm2, %v2804_v31, %v2808_v5  ;;  %v3047_v52 = vsub.s32 2, %v4235_v6 }
 0x156   : > { %v2249_v12 = vcombine.high %v2247_v25, %v2247_v25  ;;  %v4452_v13 = vrot.slane %v2248_v50, %v4244_v10  ;;  %v2941_v59 = vrot.slane %v2927_v54, %v4244_v10  ;;  %v4458_v14 = vrot.slane %v2247_v25, %v4244_v10 }
 0x157   : > { %v2278_v21 = vcombine.high %v4446_v60, %v4446_v60  ;;  %v2942_v22 = vcombine.high %v2934_v9, %v2934_v9  ;;  %v2125_v26 = vrot.slane %v2116_v61, %v4244_v10  ;;  %v2812_v23 = vcombine.high %v2810_v18, %v2810_v18 }
 0x158   : > { %v4464_v27 = vrot.slane %v2249_v12, %v4244_v10  ;;  %v2280_v42 = vcombine.high %v4452_v13, %v4452_v13  ;;  %v2943_v17 = vcombine.high %v2941_v59, %v2941_v59  ;;  %v4469_v7 = vrot.slane %v2934_v9, %v4244_v10 }
 0x159   : > { %v2132_v29 = vrot.slane %v2118_v8, %v4244_v10  ;;  %v2279_v48 = vcombine.high %v4458_v14, %v4458_v14  ;;  %v4479_v39 = vrot.slane %v2278_v21, %v4262_v28  ;;  %v4484_v41 = vrot.slane %v2941_v59, %v4244_v10 }
 0x15a   : > { %v4487_v0 = vrot.slane %v2942_v22, %v4244_v10  ;;  %v2133_v37 = vcombine.high %v2125_v26, %v2125_v26  ;;  %v2281_v30 = vcombine.high %v4464_v27, %v4464_v27  ;;  %v4492_v43 = vrot.slane %v2125_v26, %v4244_v10 }
 0x15b   : > { %v2819_v19 = vrot.slane %v2810_v18, %v4244_v10  ;;  %v2826_v57 = vrot.slane %v2812_v23, %v4244_v10  ;;  %v4497_v46 = vrot.slane %v2280_v42, %v4262_v28  ;;  %v4500_v55 = vrot.slane %v2943_v17, %v4244_v10 }
 0x15c   : > { %v2972_v51 = vcombine.high %v4469_v7, %v4469_v7  ;;  %v2134_v53 = vcombine.high %v2132_v29, %v2132_v29  ;;  %v4507_v49 = vrot.slane %v2279_v48, %v4262_v28  ;;  %v2973_v11 = vcombine.high %v4484_v41, %v4484_v41 }
 0x15d   : > { %v2974_v25 = vcombine.high %v4487_v0, %v4487_v0  ;;  %v4517_v50 = vrot.slane %v2132_v29, %v4244_v10  ;;  %v4520_v54 = vrot.slane %v2133_v37, %v4244_v10  ;;  %v2163_v31 = vcombine.high %v4492_v43, %v4492_v43 }
 0x15e   : > { %v2827_v5 = vcombine.high %v2819_v19, %v2819_v19  ;;  %v2828_v9 = vcombine.high %v2826_v57, %v2826_v57  ;;  %v2975_v12 = vcombine.high %v4500_v55, %v4500_v55  ;;  %v2987_v59 = vrot.slane %v2972_v51, %v4262_v28 }
 0x15f   : > { %v4532_v18 = vrot.slane %v2134_v53, %v4244_v10  ;;  %v2170_v21 = vrot.slane %v4492_v43, %v4262_v28  ;;  %v2835_v22 = vrot.slane %v2819_v19, %v4244_v10  ;;  %v4538_v26 = vrot.slane %v4231_v62, %v3047_v52 }
 0x160   : > { %v3055_v23 = vsub.s32 4, %v4235_v6  ;;  %v2164_v42 = vcombine.high %v4517_v50, %v4517_v50  ;;  %v2165_v17 = vcombine.high %v4520_v54, %v4520_v54  ;;  %v4549_v48 = vrot.slane %v4231_v62, %v4262_v28 }
 0x161   : > { %v2178_v37 = vrot.slane %v2163_v31, %v4262_v28  ;;  %v2842_v43 = vrot.slane %v2826_v57, %v4244_v10  ;;  %v4554_v19 = vrot.slane %v2827_v5, %v4244_v10  ;;  %v4557_v51 = vrot.slane %v2828_v9, %v4244_v10 }
 0x162   : > { %v2166_v53 = vcombine.high %v4532_v18, %v4532_v18  ;;  %v2186_v52 = vrot.slane %v4517_v50, %v4262_v28  ;;  %v3043_v3 = vsub.s32 1, %v4235_v6  ;;  %v3063_v29 = vsub.s32 6, %v4235_v6 }
 0x163   : > { %v2857_v61 = vcombine.high %v2835_v22, %v2835_v22  ;;  %v4566_v31 = vrot.slane %v4231_v62, %v3055_v23  ;;  %v4569_v57 = vrot.slane %v2973_v11, %v4262_v28  ;;  %v3051_v10 = vsub.s32 3, %v4235_v6 }
 0x164   : > { %v4573_v5 = vrot.slane %v2165_v17, %v4262_v28  ;;  %v4578_v50 = vrot.slane %v2164_v42, %v4262_v28  ;;  %v3059_v38 = vsub.s32 5, %v4235_v6  ;;  %v2858_v8 = vcombine.high %v2842_v43, %v2842_v43 }
 0x165   : > { %v2859_v23 = vcombine.high %v4554_v19, %v4554_v19  ;;  %v2860_v11 = vcombine.high %v4557_v51, %v4557_v51  ;;  %v4586_v40 = vrot.slane %v2974_v25, %v4262_v28  ;;  %v4589_v17 = vrot.slane %v2166_v53, %v4262_v28 }
 0x166   : > { %v4592_v9 = vrot.slane %v4231_v62, %v3043_v3  ;;  %v4595_v42 = vrot.slane %v4231_v62, %v3063_v29  ;;  %v2864_v35 = vrot.slane %v2835_v22, %v4262_v28  ;;  %v2872_v36 = vrot.slane %v2857_v61, %v4262_v28 }
 0x167   : > { %4838 = vst [vmem:[#allocation10_spill] sm:$0xff] %v4589_v17  ;;  %v4602_v56 = vrot.slane %v4231_v62, %v3051_v10  ;;  %v4605_v25 = vrot.slane %v2281_v30, %v4262_v28  ;;  %v2868_v3 = vrot.slane %v4554_v19, %v4262_v28  ;;  %v2880_v53 = vrot.slane %v2842_v43, %v4262_v28 }
 0x168   : > { %v4611_v29 = vrot.slane %v4231_v62, %v3059_v38  ;;  %v4614_v20 = vrot.slane %v2975_v12, %v4262_v28  ;;  %v4617_v22 = vrot.slane %v2859_v23, %v4262_v28  ;;  %v2888_v30 = vrot.slane %v2858_v8, %v4262_v28 }
 0x169   : > { %v4623_v10 = vrot.slane %v2860_v11, %v4262_v28  ;;  %v4841_v61 = vrot.slane %v4446_v60, %v4262_v28 }
 0x16a   : > { %4839 = vst [vmem:[#allocation11_spill] sm:$0xff] %v4611_v29 }
 0x16b   : > { %4840 = vst [vmem:[#allocation12_spill] sm:$0xff] %v4623_v10 }
 0x172   : > { %v4625_v19 = vpop.f32.mrb[2].mxu0 }
 0x173   : > { %v4627_v43 = vpop.f32.mrb[2].mxu1  ;;  %v3506_v38 = vpop.f32.mrb[3].mxu0  ;;  %v2324_v12 = vmul.f32 %v4479_v39, %v4625_v19  ;;  %v2209_v23 = vmul.f32 %v2178_v37, %v4625_v19  ;;  %v2322_v62 = vmul.f32 %v4841_v61, %v4625_v19  ;;  %v2207_v8 = vmul.f32 %v2170_v21, %v4625_v19 }
 0x174   : > { %v3548_v11 = vpop.f32.mrb[3].mxu1  ;;  %v2903_v10 = vmul.f32 %v2872_v36, %v4627_v43  ;;  %v3018_v29 = vmul.f32 %v2987_v59, %v4627_v43  ;;  %v2901_v17 = vmul.f32 %v2864_v35, %v4627_v43  ;;  %v4842_v39 = vrot.slane %v4469_v7, %v4262_v28 }
 0x175   : > { %v2332_v37 = vadd.f32 %v2324_v12, %v4393_v16  ;;  %v2217_v2 = vadd.f32 %v2209_v23, %v4391_v32  ;;  %v2330_v60 = vadd.f32 %v2322_v62, %v4397_v33  ;;  %v2215_v21 = vadd.f32 %v2207_v8, %v4395_v4 }
 0x176   : > { %v3016_v38 = vmul.f32 %v4842_v39, %v4627_v43  ;;  %v4843_v36 = vrot.slane %v4458_v14, %v4262_v28  ;;  %v2905_v35 = vmul.f32 %v2880_v53, %v4627_v43  ;;  %v2211_v61 = vmul.f32 %v2186_v52, %v4625_v19 }
 0x177   : > { %v3026_v7 = vadd.f32 %v3018_v29, %v2332_v37  ;;  %v2911_v11 = vadd.f32 %v2903_v10, %v2217_v2  ;;  %v2909_v12 = vadd.f32 %v2901_v17, %v2215_v21  ;;  %v4844_v62 = vrot.slane %v4484_v41, %v4262_v28 }
 0x178   : > { %v2326_v59 = vmul.f32 %v4843_v36, %v4625_v19  ;;  %v3024_v16 = vadd.f32 %v3016_v38, %v2330_v60  ;;  %v2219_v33 = vadd.f32 %v2211_v61, %v4399_v47  ;;  %v4845_v14 = vrot.slane %v4452_v13, %v4262_v28 }
 0x179   : > { %v3020_v4 = vmul.f32 %v4844_v62, %v4627_v43  ;;  %v3096_v52 = vadd.f32 %v4538_v26, %v3026_v7  ;;  %v3079_v2 = vadd.f32 %v4538_v26, %v2911_v11  ;;  %v4846_v47 = vrot.slane %v4487_v0, %v4262_v28  ;;  %v4852_v62 = vld [vmem:[#allocation7_spill] sm:$0xff] }
 0x17a   : > { %v2334_v32 = vadd.f32 %v2326_v59, %v4401_v34  ;;  %v2323_v53 = vmul.f32 %v4845_v14, %v4625_v19  ;;  %v3094_v17 = vadd.f32 %v4549_v48, %v3024_v16  ;;  %v3077_v34 = vadd.f32 %v4549_v48, %v2909_v12  ;;  %v4854_v14 = vld [vmem:[#allocation10_spill] sm:$0xff] }
 0x17b   : > { %v2913_v10 = vadd.f32 %v2905_v35, %v2219_v33  ;;  %v3017_v23 = vmul.f32 %v4846_v47, %v4627_v43  ;;  %3114 = vrot.lane.b32.xlu0 %v3096_v52, %s3868_s28  ;;  %v2902_v13 = vmul.f32 %v2868_v3, %v4627_v43  ;;  %v4847_v26 = vrot.slane %v4520_v54, %v4262_v28  ;;  %v4853_v33 = vld [vmem:[#allocation9_spill] sm:$0xff]  ;;  %v4856_v52 = vld [vmem:[#allocation12_spill] sm:$0xff] }
 0x17c   : > { %v3028_v29 = vadd.f32 %v3020_v4, %v2334_v32  ;;  %v2331_v41 = vadd.f32 %v2323_v53, %v4409_v63  ;;  %3110 = vrot.lane.b32.xlu1 %v3094_v17, %s3868_s28  ;;  %v2328_v63 = vmul.f32 %v4507_v49, %v4625_v19  ;;  %v3067_v8 = vsub.s32 7, %v4235_v6  ;;  %3088 = vst.msk [vmem:[%s4684_s14 + $0x10] sm:$0xff] %vm3085_vm3, %v3079_v2  ;;  %v4857_v17 = vld [vmem:[#allocation6_spill] sm:$0xff] }
 0x17d   : > { %v2208_v48 = vmul.f32 %v4847_v26, %v4625_v19  ;;  %3086 = vst.msk [vmem:[%s4684_s14] sm:$0xff] %vm3085_vm3, %v3077_v34  ;;  %v3081_v3 = vadd.f32 %v4566_v31, %v2913_v10  ;;  %v3022_v39 = vmul.f32 %v4569_v57, %v4627_v43  ;;  %v2213_v38 = vmul.f32 %v4578_v50, %v4625_v19 }
 0x17e   : > { %v3098_v0 = vadd.f32 %v4566_v31, %v3028_v29  ;;  %v3025_v54 = vadd.f32 %v3017_v23, %v2331_v41  ;;  %v2336_v6 = vadd.f32 %v2328_v63, %v4414_v44  ;;  %v2325_v37 = vmul.f32 %v4497_v46, %v4625_v19  ;;  %v4858_v29 = vld [vmem:[#allocation8_spill] sm:$0xff] }
 0x17f   : > { %v2216_v49 = vadd.f32 %v2208_v48, %v4407_v45  ;;  %v2907_v21 = vmul.f32 %v2888_v30, %v4627_v43  ;;  %v3019_v31 = vmul.f32 %v4586_v40, %v4627_v43  ;;  %v2210_v57 = vmul.f32 %v4573_v5, %v4625_v19  ;;  %3090 = vst.msk [vmem:[%s4684_s14 + $0x20] sm:$0xff] %vm3085_vm3, %v3081_v3 }
 0x180   : > { %v3095_v60 = vadd.f32 %v4592_v9, %v3025_v54  ;;  %3118 = vrot.lane.b32.xlu0 %v3098_v0, %s3868_s28  ;;  %v3030_v44 = vadd.f32 %v3022_v39, %v2336_v6  ;;  %v2221_v50 = vadd.f32 %v2213_v38, %v4412_v15  ;;  %v2333_v46 = vadd.f32 %v2325_v37, %v4421_v58 }
 0x181   : > { %v2910_v45 = vadd.f32 %v2902_v13, %v2216_v49  ;;  %v2904_v30 = vmul.f32 %v4617_v22, %v4627_v43  ;;  %v2218_v40 = vadd.f32 %v2210_v57, %v4419_v24  ;;  %v4848_v5 = vrot.slane %v4464_v27, %v4262_v28 }
 0x182   : > { %3112 = vrot.lane.b32.xlu1 %v3095_v60, %s3868_s28  ;;  %v4849_v59 = vrot.slane %v4500_v55, %v4262_v28  ;;  %v3100_v35 = vadd.f32 %v4595_v42, %v3030_v44  ;;  %v2915_v61 = vadd.f32 %v2907_v21, %v2221_v50  ;;  %v3027_v7 = vadd.f32 %v3019_v31, %v2333_v46 }
 0x183   : > { %v2327_v36 = vmul.f32 %v4848_v5, %v4625_v19  ;;  %v3078_v58 = vadd.f32 %v4592_v9, %v2910_v45  ;;  %v2912_v22 = vadd.f32 %v2904_v30, %v2218_v40  ;;  %v4850_v27 = vrot.slane %v4532_v18, %v4262_v28 }
 0x184   : > { %v3021_v15 = vmul.f32 %v4849_v59, %v4627_v43  ;;  %v2329_v16 = vmul.f32 %v4605_v25, %v4625_v19  ;;  %3122 = vrot.lane.b32.xlu0 %v3100_v35, %s3868_s28  ;;  %v3083_v55 = vadd.f32 %v4595_v42, %v2915_v61  ;;  %v3097_v9 = vadd.f32 %v4602_v56, %v3027_v7 }
 0x185   : > { %v2335_v24 = vadd.f32 %v2327_v36, %v4432_v1  ;;  %v2212_v11 = vmul.f32 %v4850_v27, %v4625_v19  ;;  %v4851_v12 = vrot.slane %v4557_v51, %v4262_v28  ;;  %v3023_v32 = vmul.f32 %v4614_v20, %v4627_v43  ;;  %3087 = vst.msk [vmem:[%s4684_s14 + $0x8] sm:$0xff] %vm3085_vm3, %v3078_v58  ;;  %v4855_v51 = vld [vmem:[#allocation11_spill] sm:$0xff] }
 0x186   : > { %v3080_v18 = vadd.f32 %v4602_v56, %v2912_v22  ;;  %v2337_v42 = vadd.f32 %v2329_v16, %v4853_v33  ;;  %3116 = vrot.lane.b32.xlu1 %v3097_v9, %s3868_s28  ;;  %v2214_v53 = vmul.f32 %v4854_v14, %v4625_v19  ;;  %3092 = vst.msk [vmem:[%s4684_s14 + $0x30] sm:$0xff] %vm3085_vm3, %v3083_v55 }
 0x187   : > { %v2906_v1 = vmul.f32 %v4851_v12, %v4627_v43  ;;  %v3029_v25 = vadd.f32 %v3021_v15, %v2335_v24  ;;  %v2220_v4 = vadd.f32 %v2212_v11, %v4852_v62  ;;  %v2908_v2 = vmul.f32 %v4856_v52, %v4627_v43 }
 0x188   : > { %v3031_v20 = vadd.f32 %v3023_v32, %v2337_v42  ;;  %3089 = vst.msk [vmem:[%s4684_s14 + $0x18] sm:$0xff] %vm3085_vm3, %v3080_v18  ;;  %v3068_v34 = vrot.slane %v4857_v17, %v3067_v8  ;;  %v2222_v10 = vadd.f32 %v2214_v53, %v4858_v29 }
 0x189   : > { %v2914_v28 = vadd.f32 %v2906_v1, %v2220_v4  ;;  %v3099_v56 = vadd.f32 %v4855_v51, %v3029_v25 }
 0x18a   : > { %v2916_v41 = vadd.f32 %v2908_v2, %v2222_v10  ;;  %v3101_v47 = vadd.f32 %v3068_v34, %v3031_v20 }
 0x18b   : > { %v3082_v19 = vadd.f32 %v4855_v51, %v2914_v28  ;;  %3120 = vrot.lane.b32.xlu1 %v3099_v56, %s3868_s28 }
 0x18c   : > { %v3084_v23 = vadd.f32 %v3068_v34, %v2916_v41 }
 0x18d   : > { %3091 = vst.msk [vmem:[%s4684_s14 + $0x28] sm:$0xff] %vm3085_vm3, %v3082_v19 }
 0x18e   : > { %3093 = vst.msk [vmem:[%s4684_s14 + $0x38] sm:$0xff] %vm3085_vm3, %v3084_v23 }
 0x18f   : > { %3124 = vrot.lane.b32.xlu1 %v3101_v47, %s3868_s28 }
 0x1ed   : > { %v3115_v43 = vpop.permute.xlu0 %3114 }
 0x1ee   : > { %v3111_v13 = vpop.permute.xlu1 %3110  ;;  %3137 = vst.msk [vmem:[%s4684_s14 + $0x10] sm:$0xff] %vm3134_vm4, %v3115_v43 }
 0x1ef   : > { %3135 = vst.msk [vmem:[%s4684_s14] sm:$0xff] %vm3134_vm4, %v3111_v13 }
 0x1f2   : > { %v3119_v26 = vpop.permute.xlu0 %3118 }
 0x1f3   : > { %3139 = vst.msk [vmem:[%s4684_s14 + $0x20] sm:$0xff] %vm3134_vm4, %v3119_v26 }
 0x1f4   : > { %v3113_v48 = vpop.permute.xlu1 %3112 }
 0x1f5   : > { %3136 = vst.msk [vmem:[%s4684_s14 + $0x8] sm:$0xff] %vm3134_vm4, %v3113_v48  ;;  %v3199_v49 = vld [vmem:[%s4684_s14 + $0x10] sm:$0xff] (%p4859_p7) }
 0x1f6   : > { %v3123_v63 = vpop.permute.xlu0 %3122  ;;  %v3195_v54 = vld [vmem:[%s4684_s14] sm:$0xff] (%p4859_p7)  ;;  %3200 = vst [vmem:[%s3153_s15 + $0x20] sm:$0xff] (%p4859_p7), %v3199_v49 }
 0x1f7   : > { %3141 = vst.msk [vmem:[%s4684_s14 + $0x30] sm:$0xff] %vm3134_vm4, %v3123_v63  ;;  %3196 = vst [vmem:[%s3153_s15] sm:$0xff] (%p4859_p7), %v3195_v54 }
 0x1f8   : > { %v3117_v8 = vpop.permute.xlu1 %3116 }
 0x1f9   : > { %3138 = vst.msk [vmem:[%s4684_s14 + $0x18] sm:$0xff] %vm3134_vm4, %v3117_v8 }
 0x1fa   : > { %v3203_v38 = vld [vmem:[%s4684_s14 + $0x20] sm:$0xff] (%p4859_p7) }
 0x1fb   : > { %3204 = vst [vmem:[%s3153_s15 + $0x40] sm:$0xff] (%p4859_p7), %v3203_v38 }
 0x1fc   : > { %3149 = sbr.rel (!%p4859_p7) target bundleno = 523 (0x20b), region = 44  ;;  %v3197_v39 = vld [vmem:[%s4684_s14 + $0x8] sm:$0xff] (%p4859_p7) }
 0x1fd   : > { %v3121_v0 = vpop.permute.xlu1 %3120  ;;  %3198 = vst [vmem:[%s3153_s15 + $0x10] sm:$0xff] (%p4859_p7), %v3197_v39 }
 0x1fe   : > { %3140 = vst.msk [vmem:[%s4684_s14 + $0x28] sm:$0xff] %vm3134_vm4, %v3121_v0  ;;  %v3207_v60 = vld [vmem:[%s4684_s14 + $0x30] sm:$0xff] (%p4859_p7) }
 0x1ff   : > { %3208 = vst [vmem:[%s3153_s15 + $0x60] sm:$0xff] (%p4859_p7), %v3207_v60 }
 0x200   : > { %v3201_v6 = vld [vmem:[%s4684_s14 + $0x18] sm:$0xff] (%p4859_p7) }
 0x201   : > { %v3125_v3 = vpop.permute.xlu1 %3124  ;;  %3202 = vst [vmem:[%s3153_s15 + $0x30] sm:$0xff] (%p4859_p7), %v3201_v6 }
 0x202   : > { %3142 = vst.msk [vmem:[%s4684_s14 + $0x38] sm:$0xff] %vm3134_vm4, %v3125_v3 }
 0x205   : > { %v3205_v37 = vld [vmem:[%s4684_s14 + $0x28] sm:$0xff] }
 0x206   : > { %3206 = vst [vmem:[%s3153_s15 + $0x50] sm:$0xff] %v3205_v37 }
 0x209   : > { %v3209_v21 = vld [vmem:[%s4684_s14 + $0x38] sm:$0xff] }
 0x20a   : > { %3210 = vst [vmem:[%s3153_s15 + $0x70] sm:$0xff] %v3209_v21 }
 0x20b PF: > { %s17_s22 = sadd.s32 1, %s3854_s22   ;;  %s4860_s15 = smov %s3830_s16 }
 0x20c   : > { %p14_p9 = scmp.ge.s32.totalorder %s17_s22, 6   ;;  %s4861_s16 = smov %s3834_s17 }
 0x20d   : > { %s4862_s17 = smov %s3971_s9  ;;  %s4863_s18 = smov %s3846_s20 }
 0x20e   : > { %s4864_s19 = smov %s3850_s21  ;;  %s4865_s20 = smov %s4868_s24 }
 0x20f   : > { %s4866_s21 = smov %s4872_s25  ;;  %16 = sbr.rel (!%p14_p9) target bundleno = 5 (0x5), region = 117 }
 0x216   :  { %3226 = vsyncpa [#allocation3], 1 }
 0x217   :  { %3228 = vsyncpa [#allocation3 + $0x1], 1 }

</bundles_post_ra>
